<compile_context>
chip_gen: v6e
topology: v6e:2x2x1
jax: 0.10.0
libtpu: 0.0.40
codegen_flags: <defaults>
</compile_context>

<pallas_src>
import functools

import jax
import jax.numpy as jnp
from jax.experimental import pallas as pl
from jax.experimental.pallas import tpu as pltpu

LANE = 128
NODE_TILE = 16   # bf16 native sublane tile is (16, 128)


def _round_up(v, m):
    return (v + m - 1) // m * m


def _vmem_limit_bytes():
    """~85% of this generation's VMEM (v5e/v6e 128 MiB, v7x 64 MiB)."""
    cap = 64 * 1024 * 1024  # safe lower bound (v7x per-TC VMEM)
    try:
        cap = int(pltpu.get_tpu_info().vmem_capacity_bytes)
    except Exception:
        pass
    return int(cap * 0.85)


# ----------------------------- Pallas kernel ------------------------------

def _imbgnn_fused_kernel(num_layers,
                         m_ref, x_ref, w1_ref, w2_ref, bias_ref,
                         lw1_ref, lb1_ref, lw2_ref, lb2_ref,
                         out_ref):
    """Whole ImbGNN forward for ONE graph (one grid step).

    bf16 MXU matmuls with f32 accumulation for the MLPs; the aggregation
    M @ h keeps M in f32 so edge multiplicities are exact. h never leaves
    VMEM across the 5 layers + head.
    """
    m = m_ref[...]                       # f32  [Np, Np]
    h = x_ref[...]                       # bf16 [Np, Dp]

    for layer in range(num_layers):      # static unroll; h stays on-chip
        # GINConv aggregation: (A + (1+eps) I) @ h  ==  M @ h
        # TODO(synk): for large graphs replace this dense O(Np^2) matmul with
        # row-tiled / block-sparse aggregation (PrefetchScalarGridSpec with a
        # nonzero-block list) so M never needs to be fully VMEM-resident.
        agg = jnp.dot(m, h.astype(jnp.float32),
                      preferred_element_type=jnp.float32)
        bl = bias_ref[layer]             # f32 [2, Hp]: (b1 with BN folded, b2)
        # MLP: Linear(+folded eval BatchNorm) -> ReLU -> Linear -> ReLU
        t = jnp.dot(agg.astype(jnp.bfloat16), w1_ref[layer],
                    preferred_element_type=jnp.float32) + bl[0:1, :]
        t = jnp.maximum(t, 0.0)
        t = jnp.dot(t.astype(jnp.bfloat16), w2_ref[layer],
                    preferred_element_type=jnp.float32) + bl[1:2, :]
        h = jnp.maximum(t, 0.0).astype(jnp.bfloat16)
        # TODO(synk): training-mode dropout between conv layers (use_drop) is
        # identity in eval mode and is not implemented here.

    # Head: lin1 -> ReLU -> (dropout identity in eval) -> lin2 -> log_softmax
    t = jnp.dot(h, lw1_ref[...], preferred_element_type=jnp.float32) + lb1_ref[...]
    t = jnp.maximum(t, 0.0)
    # lin2_b already carries -1e30 on padded class lanes, so reducing over all
    # 128 lanes is exact for the real classes (no iota / where needed).
    logits = jnp.dot(t.astype(jnp.bfloat16), lw2_ref[...],
                     preferred_element_type=jnp.float32) + lb2_ref[...]

    mx = jnp.max(logits, axis=1, keepdims=True)
    z = logits - mx
    lse = jnp.log(jnp.sum(jnp.exp(z), axis=1, keepdims=True))
    out_ref[...] = z - lse


# ----------------------------- Model wrapper ------------------------------

def init_params(key, feature_size, hidden_size, num_class):
    """Deterministic synthetic parameters (eval-mode BN running stats)."""
    params = {}
    bn_eps = 1e-5
    gin_eps = 0.0  # PyG GINConv default eps (train_eps=False)

    def linear(key, fan_in, fan_out):
        k_w, k_b = jax.random.split(key)
        lim = 1.0 / jnp.sqrt(fan_in)
        w = jax.random.uniform(k_w, (fan_in, fan_out), jnp.float32, -lim, lim)
        b = jax.random.uniform(k_b, (1, fan_out), jnp.float32, -lim, lim)
        return w, b

    keys = jax.random.split(key, 12)
    k_idx = 0
    convs = []
    for layer in range(5):
        fin = feature_size if layer == 0 else hidden_size
        w1, b1 = linear(keys[k_idx], fin, hidden_size); k_idx += 1
        w2, b2 = linear(keys[k_idx], hidden_size, hidden_size); k_idx += 1
        # BatchNorm1d eval: gamma=1, beta=0, running_mean=0, running_var=1
        gamma = jnp.ones((1, hidden_size), jnp.float32)
        beta = jnp.zeros((1, hidden_size), jnp.float32)
        run_mean = jnp.zeros((1, hidden_size), jnp.float32)
        run_var = jnp.ones((1, hidden_size), jnp.float32)
        scale = gamma / jnp.sqrt(run_var + bn_eps)
        shift = beta - run_mean * scale
        convs.append(dict(w1=w1, b1=b1, scale=scale, shift=shift, w2=w2, b2=b2))
    lin1_w, lin1_b = linear(keys[k_idx], hidden_size, hidden_size); k_idx += 1
    lin2_w, lin2_b = linear(keys[k_idx], hidden_size, num_class); k_idx += 1
    params["convs"] = convs
    params["lin1"] = (lin1_w, lin1_b)
    params["lin2"] = (lin2_w, lin2_b)
    params["gin_eps"] = gin_eps
    return params


def build_propagation_matrix(edge_index, num_nodes, gin_eps):
    # A[dst, src] = #edges src->dst ; M = A + (1+eps) * I.  Kept in f32 so
    # edge multiplicities and the (1+eps) diagonal are exact.
    # TODO(synk): for large/sparse graphs build a block-sparse representation
    # (per-row-tile list of nonzero (tm, tk) blocks) instead of dense O(N^2).
    src = edge_index[0]
    dst = edge_index[1]
    a = jnp.zeros((num_nodes, num_nodes), jnp.float32).at[dst, src].add(1.0)
    return a + (1.0 + gin_eps) * jnp.eye(num_nodes, dtype=jnp.float32)


def pack_params(params, feature_size, hidden_size, num_class):
    """Fold BN into w1/b1, pad to lane-dense slabs, coalesce per-layer biases,
    and bake the padded-class mask into the lin2 bias."""
    d_pad = _round_up(max(feature_size, hidden_size), LANE)
    h_pad = d_pad                      # one padded channel width end-to-end
    c_pad = _round_up(num_class, LANE)

    def pad2(a, rows, cols):
        return jnp.zeros((rows, cols), a.dtype).at[:a.shape[0], :a.shape[1]].set(a)

    w1s, w2s, biases = [], [], []
    for c in params["convs"]:
        # Eval-mode BN fold:  (x@w1 + b1)*scale + shift == x@(w1*scale) + (b1*scale + shift)
        w1f = c["w1"] * c["scale"]
        b1f = c["b1"] * c["scale"] + c["shift"]
        w1s.append(pad2(w1f, d_pad, h_pad))
        w2s.append(pad2(c["w2"], h_pad, h_pad))
        biases.append(jnp.concatenate([pad2(b1f, 1, h_pad),
                                       pad2(c["b2"], 1, h_pad)], axis=0))

    lin2_w, lin2_b = params["lin2"]
    # Padded class lanes get -1e30 so the in-kernel log-softmax over all
    # c_pad lanes is exact for the real classes.
    lb2 = jnp.full((1, c_pad), -1e30, jnp.float32).at[:, :num_class].set(lin2_b)

    packed = dict(
        w1=jnp.stack(w1s).astype(jnp.bfloat16),     # [L, Dp, Hp] bf16
        w2=jnp.stack(w2s).astype(jnp.bfloat16),     # [L, Hp, Hp] bf16
        bias=jnp.stack(biases),                     # [L, 2, Hp]  f32
        lin1_w=pad2(params["lin1"][0], h_pad, h_pad).astype(jnp.bfloat16),
        lin1_b=pad2(params["lin1"][1], 1, h_pad),
        lin2_w=pad2(lin2_w, h_pad, c_pad).astype(jnp.bfloat16),
        lin2_b=lb2,
    )
    return packed


@functools.partial(jax.jit, static_argnames=("num_class",))
def imbgnn_forward(x, m, packed, num_class):
    """x: [B, N, F] node features, m: [B, N, N] propagation matrices.
    Returns per-node log-probs [B, N, num_class]."""
    batch, num_nodes, feat = x.shape
    n_pad = _round_up(num_nodes, NODE_TILE)
    num_layers, d_pad, h_pad = packed["w1"].shape
    c_pad = packed["lin2_w"].shape[1]

    x_p = jnp.zeros((batch, n_pad, d_pad), jnp.float32)
    x_p = x_p.at[:, :num_nodes, :feat].set(x).astype(jnp.bfloat16)
    m_p = jnp.zeros((batch, n_pad, n_pad), jnp.float32)
    m_p = m_p.at[:, :num_nodes, :num_nodes].set(m)      # keep f32 (exact counts)

    kernel = functools.partial(_imbgnn_fused_kernel, num_layers)

    # Weights: full-array blocks with a constant index map -> DMA'd once and
    # kept VMEM-resident across all grid steps (no re-fetch on revisits).
    spec2 = lambda shape: pl.BlockSpec(shape, lambda b: (0, 0))
    spec3 = lambda shape: pl.BlockSpec(shape, lambda b: (0, 0, 0))

    in_specs = [
        pl.BlockSpec((None, n_pad, n_pad), lambda b: (b, 0, 0)),   # m (per graph)
        pl.BlockSpec((None, n_pad, d_pad), lambda b: (b, 0, 0)),   # x (per graph)
        spec3(packed["w1"].shape),
        spec3(packed["w2"].shape),
        spec3(packed["bias"].shape),
        spec2(packed["lin1_w"].shape),
        spec2(packed["lin1_b"].shape),
        spec2(packed["lin2_w"].shape),
        spec2(packed["lin2_b"].shape),
    ]
    out_spec = pl.BlockSpec((None, n_pad, c_pad), lambda b: (b, 0, 0))

    operands = [m_p, x_p, packed["w1"], packed["w2"], packed["bias"],
                packed["lin1_w"], packed["lin1_b"],
                packed["lin2_w"], packed["lin2_b"]]

    flops = batch * (num_layers * (2 * n_pad * n_pad * d_pad
                                   + 2 * n_pad * d_pad * h_pad
                                   + 2 * n_pad * h_pad * h_pad)
                     + 2 * n_pad * h_pad * h_pad
                     + 2 * n_pad * h_pad * c_pad)
    bytes_accessed = sum(int(a.size) * a.dtype.itemsize for a in operands) \
        + batch * n_pad * c_pad * 4

    # TODO(synk): for single very large graphs add a node-row-tile grid axis
    # (M streamed as (tm, Np) blocks) so M is never fully VMEM-resident and
    # the v7x 64 MiB ceiling is not hit.
    out = pl.pallas_call(
        kernel,
        out_shape=jax.ShapeDtypeStruct((batch, n_pad, c_pad), jnp.float32),
        grid_spec=pltpu.PrefetchScalarGridSpec(
            num_scalar_prefetch=0,
            grid=(batch,),
            in_specs=in_specs,
            out_specs=out_spec),
        compiler_params=pltpu.CompilerParams(
            dimension_semantics=("parallel",),
            vmem_limit_bytes=_vmem_limit_bytes()),
        cost_estimate=pl.CostEstimate(
            flops=flops,
            transcendentals=batch * n_pad * (c_pad + 1),
            bytes_accessed=bytes_accessed),
    )(*operands)
    return out[:, :num_nodes, :num_class]


def imbgnn_forward_ref(x, m, params):
    """Pure-JAX reference for one graph, mirroring the kernel's dtype strategy
    (f32 M, bf16 activations/weights, f32 accumulation, folded eval BN)."""
    bf16, f32 = jnp.bfloat16, jnp.float32
    m = m.astype(f32)
    h = x.astype(bf16)
    for c in params["convs"]:
        w1f = (c["w1"] * c["scale"]).astype(bf16)
        b1f = c["b1"] * c["scale"] + c["shift"]
        agg = jnp.dot(m, h.astype(f32), preferred_element_type=f32)
        t = jnp.dot(agg.astype(bf16), w1f, preferred_element_type=f32) + b1f
        t = jnp.maximum(t, 0.0)
        t = jnp.dot(t.astype(bf16), c["w2"].astype(bf16),
                    preferred_element_type=f32) + c["b2"]
        h = jnp.maximum(t, 0.0).astype(bf16)
    lin1_w, lin1_b = params["lin1"]
    lin2_w, lin2_b = params["lin2"]
    t = jnp.maximum(jnp.dot(h, lin1_w.astype(bf16),
                            preferred_element_type=f32) + lin1_b, 0.0)
    logits = jnp.dot(t.astype(bf16), lin2_w.astype(bf16),
                     preferred_element_type=f32) + lin2_b
    return jax.nn.log_softmax(logits, axis=1)


# ----------------------------------- Main ---------------------------------

if __name__ == "__main__":
    feature_size = 32
    hidden_size = 32    # NOTE: 256 would better fill the 256-wide MXU on v6e/v7x
    num_class = 4
    num_nodes = 16
    num_edges = 40
    batch = 4           # batch of graphs -> "parallel" grid axis

    key = jax.random.PRNGKey(0)
    k_x, k_e, k_p = jax.random.split(key, 3)

    # Batched graph.x : [batch, num_nodes, feature_size]
    xs = jax.random.normal(k_x, (batch, num_nodes, feature_size), jnp.float32)
    # Per-graph edge_index : [2, num_edges] (int)
    edge_keys = jax.random.split(k_e, batch)
    edge_indices = [jax.random.randint(k, (2, num_edges), 0, num_nodes)
                    for k in edge_keys]

    params = init_params(k_p, feature_size, hidden_size, num_class)
    ms = jnp.stack([build_propagation_matrix(ei, num_nodes, params["gin_eps"])
                    for ei in edge_indices])
    packed = pack_params(params, feature_size, hidden_size, num_class)

    out = imbgnn_forward(xs, ms, packed, num_class)
    out = jax.block_until_ready(out)

    assert out.shape == (batch, num_nodes, num_class)
    assert bool(jnp.all(jnp.isfinite(out)))
    for g in range(batch):
        ref = imbgnn_forward_ref(xs[g], ms[g], params)
        # Tolerance covers bf16 matmul rounding / XLA excess-precision diffs.
        assert jnp.allclose(out[g], ref, atol=5e-2, rtol=5e-2), \
            f"mismatch vs reference for graph {g}"

    print("KERNEL_OK")
</pallas_src>

<mosaic_0001>
module attributes {stable_mosaic.version = 11 : i64} {
  func.func @_imbgnn_fused_kernel(%arg0: i32, %arg1: memref<1x16x16xf32, #tpu.memory_space<vmem>>, %arg2: memref<1x16x128xbf16, #tpu.memory_space<vmem>>, %arg3: memref<5x128x128xbf16, #tpu.memory_space<vmem>>, %arg4: memref<5x128x128xbf16, #tpu.memory_space<vmem>>, %arg5: memref<5x2x128xf32, #tpu.memory_space<vmem>>, %arg6: memref<128x128xbf16, #tpu.memory_space<vmem>>, %arg7: memref<1x128xf32, #tpu.memory_space<vmem>>, %arg8: memref<128x128xbf16, #tpu.memory_space<vmem>>, %arg9: memref<1x128xf32, #tpu.memory_space<vmem>>, %arg10: memref<1x16x128xf32, #tpu.memory_space<vmem>>) attributes {dimension_semantics = [#tpu.dimension_semantics<parallel>], iteration_bounds = array<i64: 4>, scalar_prefetch = 0 : i64, scratch_operands = 0 : i64, tpu.core_type = #tpu.core_type<tc>, window_params = [{transform_indices = @transform_0, window_bounds = array<i64: 1, 16, 16>}, {transform_indices = @transform_1, window_bounds = array<i64: 1, 16, 128>}, {pipeline_mode = #tpu.pipeline_mode<synchronous>, transform_indices = @transform_2, window_bounds = array<i64: 5, 128, 128>}, {pipeline_mode = #tpu.pipeline_mode<synchronous>, transform_indices = @transform_3, window_bounds = array<i64: 5, 128, 128>}, {pipeline_mode = #tpu.pipeline_mode<synchronous>, transform_indices = @transform_4, window_bounds = array<i64: 5, 2, 128>}, {pipeline_mode = #tpu.pipeline_mode<synchronous>, transform_indices = @transform_5, window_bounds = array<i64: 128, 128>}, {pipeline_mode = #tpu.pipeline_mode<synchronous>, transform_indices = @transform_6, window_bounds = array<i64: 1, 128>}, {pipeline_mode = #tpu.pipeline_mode<synchronous>, transform_indices = @transform_7, window_bounds = array<i64: 128, 128>}, {pipeline_mode = #tpu.pipeline_mode<synchronous>, transform_indices = @transform_8, window_bounds = array<i64: 1, 128>}, {transform_indices = @transform_9, window_bounds = array<i64: 1, 16, 128>}]} {
    %c0 = arith.constant 0 : index
    %c0_0 = arith.constant 0 : index
    %c0_1 = arith.constant 0 : index
    %0 = vector.load %arg1[%c0, %c0_0, %c0_1] : memref<1x16x16xf32, #tpu.memory_space<vmem>>, vector<1x16x16xf32>
    %1 = vector.shape_cast %0 : vector<1x16x16xf32> to vector<16x16xf32>
    %c0_2 = arith.constant 0 : index
    %c0_3 = arith.constant 0 : index
    %c0_4 = arith.constant 0 : index
    %2 = vector.load %arg2[%c0_2, %c0_3, %c0_4] : memref<1x16x128xbf16, #tpu.memory_space<vmem>>, vector<1x16x128xbf16>
    %3 = vector.shape_cast %2 : vector<1x16x128xbf16> to vector<16x128xbf16>
    %4 = arith.extf %3 : vector<16x128xbf16> to vector<16x128xf32>
    %cst = arith.constant dense<0.000000e+00> : vector<16x128xf32>
    %5 = tpu.matmul %1, %4, %cst {dimension_numbers = #tpu.dot_dimension_numbers<[1], [0], [0], [1], [0, 0, 1, 1], [], []>} : vector<16x16xf32>, vector<16x128xf32>, vector<16x128xf32> -> vector<16x128xf32>
    %c0_5 = arith.constant 0 : index
    %c0_6 = arith.constant 0 : index
    %c0_7 = arith.constant 0 : index
    %6 = vector.load %arg5[%c0_5, %c0_6, %c0_7] : memref<5x2x128xf32, #tpu.memory_space<vmem>>, vector<1x2x128xf32>
    %7 = vector.shape_cast %6 : vector<1x2x128xf32> to vector<2x128xf32>
    %8 = arith.truncf %5 : vector<16x128xf32> to vector<16x128xbf16>
    %c0_8 = arith.constant 0 : index
    %c0_9 = arith.constant 0 : index
    %c0_10 = arith.constant 0 : index
    %9 = vector.load %arg3[%c0_8, %c0_9, %c0_10] : memref<5x128x128xbf16, #tpu.memory_space<vmem>>, vector<1x128x128xbf16>
    %10 = vector.shape_cast %9 : vector<1x128x128xbf16> to vector<128x128xbf16>
    %cst_11 = arith.constant dense<0.000000e+00> : vector<16x128xf32>
    %11 = tpu.matmul %8, %10, %cst_11 {dimension_numbers = #tpu.dot_dimension_numbers<[1], [0], [0], [1], [0, 0, 1, 1], [], []>} : vector<16x128xbf16>, vector<128x128xbf16>, vector<16x128xf32> -> vector<16x128xf32>
    %12 = vector.extract_strided_slice %7 {offsets = [0, 0], sizes = [1, 128], strides = [1, 1]} : vector<2x128xf32> to vector<1x128xf32>
    %13 = vector.broadcast %12 : vector<1x128xf32> to vector<16x128xf32>
    %14 = arith.addf %11, %13 : vector<16x128xf32>
    %cst_12 = arith.constant 0.000000e+00 : f32
    %15 = vector.broadcast %cst_12 : f32 to vector<16x128xf32>
    %16 = arith.maximumf %14, %15 : vector<16x128xf32>
    %17 = arith.truncf %16 : vector<16x128xf32> to vector<16x128xbf16>
    %c0_13 = arith.constant 0 : index
    %c0_14 = arith.constant 0 : index
    %c0_15 = arith.constant 0 : index
    %18 = vector.load %arg4[%c0_13, %c0_14, %c0_15] : memref<5x128x128xbf16, #tpu.memory_space<vmem>>, vector<1x128x128xbf16>
    %19 = vector.shape_cast %18 : vector<1x128x128xbf16> to vector<128x128xbf16>
    %cst_16 = arith.constant dense<0.000000e+00> : vector<16x128xf32>
    %20 = tpu.matmul %17, %19, %cst_16 {dimension_numbers = #tpu.dot_dimension_numbers<[1], [0], [0], [1], [0, 0, 1, 1], [], []>} : vector<16x128xbf16>, vector<128x128xbf16>, vector<16x128xf32> -> vector<16x128xf32>
    %21 = vector.extract_strided_slice %7 {offsets = [1, 0], sizes = [1, 128], strides = [1, 1]} : vector<2x128xf32> to vector<1x128xf32>
    %22 = vector.broadcast %21 : vector<1x128xf32> to vector<16x128xf32>
    %23 = arith.addf %20, %22 : vector<16x128xf32>
    %cst_17 = arith.constant 0.000000e+00 : f32
    %24 = vector.broadcast %cst_17 : f32 to vector<16x128xf32>
    %25 = arith.maximumf %23, %24 : vector<16x128xf32>
    %26 = arith.truncf %25 : vector<16x128xf32> to vector<16x128xbf16>
    %27 = arith.extf %26 : vector<16x128xbf16> to vector<16x128xf32>
    %cst_18 = arith.constant dense<0.000000e+00> : vector<16x128xf32>
    %28 = tpu.matmul %1, %27, %cst_18 {dimension_numbers = #tpu.dot_dimension_numbers<[1], [0], [0], [1], [0, 0, 1, 1], [], []>} : vector<16x16xf32>, vector<16x128xf32>, vector<16x128xf32> -> vector<16x128xf32>
    %c1 = arith.constant 1 : index
    %c0_19 = arith.constant 0 : index
    %c0_20 = arith.constant 0 : index
    %29 = vector.load %arg5[%c1, %c0_19, %c0_20] : memref<5x2x128xf32, #tpu.memory_space<vmem>>, vector<1x2x128xf32>
    %30 = vector.shape_cast %29 : vector<1x2x128xf32> to vector<2x128xf32>
    %31 = arith.truncf %28 : vector<16x128xf32> to vector<16x128xbf16>
    %c1_21 = arith.constant 1 : index
    %c0_22 = arith.constant 0 : index
    %c0_23 = arith.constant 0 : index
    %32 = vector.load %arg3[%c1_21, %c0_22, %c0_23] : memref<5x128x128xbf16, #tpu.memory_space<vmem>>, vector<1x128x128xbf16>
    %33 = vector.shape_cast %32 : vector<1x128x128xbf16> to vector<128x128xbf16>
    %cst_24 = arith.constant dense<0.000000e+00> : vector<16x128xf32>
    %34 = tpu.matmul %31, %33, %cst_24 {dimension_numbers = #tpu.dot_dimension_numbers<[1], [0], [0], [1], [0, 0, 1, 1], [], []>} : vector<16x128xbf16>, vector<128x128xbf16>, vector<16x128xf32> -> vector<16x128xf32>
    %35 = vector.extract_strided_slice %30 {offsets = [0, 0], sizes = [1, 128], strides = [1, 1]} : vector<2x128xf32> to vector<1x128xf32>
    %36 = vector.broadcast %35 : vector<1x128xf32> to vector<16x128xf32>
    %37 = arith.addf %34, %36 : vector<16x128xf32>
    %cst_25 = arith.constant 0.000000e+00 : f32
    %38 = vector.broadcast %cst_25 : f32 to vector<16x128xf32>
    %39 = arith.maximumf %37, %38 : vector<16x128xf32>
    %40 = arith.truncf %39 : vector<16x128xf32> to vector<16x128xbf16>
    %c1_26 = arith.constant 1 : index
    %c0_27 = arith.constant 0 : index
    %c0_28 = arith.constant 0 : index
    %41 = vector.load %arg4[%c1_26, %c0_27, %c0_28] : memref<5x128x128xbf16, #tpu.memory_space<vmem>>, vector<1x128x128xbf16>
    %42 = vector.shape_cast %41 : vector<1x128x128xbf16> to vector<128x128xbf16>
    %cst_29 = arith.constant dense<0.000000e+00> : vector<16x128xf32>
    %43 = tpu.matmul %40, %42, %cst_29 {dimension_numbers = #tpu.dot_dimension_numbers<[1], [0], [0], [1], [0, 0, 1, 1], [], []>} : vector<16x128xbf16>, vector<128x128xbf16>, vector<16x128xf32> -> vector<16x128xf32>
    %44 = vector.extract_strided_slice %30 {offsets = [1, 0], sizes = [1, 128], strides = [1, 1]} : vector<2x128xf32> to vector<1x128xf32>
    %45 = vector.broadcast %44 : vector<1x128xf32> to vector<16x128xf32>
    %46 = arith.addf %43, %45 : vector<16x128xf32>
    %cst_30 = arith.constant 0.000000e+00 : f32
    %47 = vector.broadcast %cst_30 : f32 to vector<16x128xf32>
    %48 = arith.maximumf %46, %47 : vector<16x128xf32>
    %49 = arith.truncf %48 : vector<16x128xf32> to vector<16x128xbf16>
    %50 = arith.extf %49 : vector<16x128xbf16> to vector<16x128xf32>
    %cst_31 = arith.constant dense<0.000000e+00> : vector<16x128xf32>
    %51 = tpu.matmul %1, %50, %cst_31 {dimension_numbers = #tpu.dot_dimension_numbers<[1], [0], [0], [1], [0, 0, 1, 1], [], []>} : vector<16x16xf32>, vector<16x128xf32>, vector<16x128xf32> -> vector<16x128xf32>
    %c2 = arith.constant 2 : index
    %c0_32 = arith.constant 0 : index
    %c0_33 = arith.constant 0 : index
    %52 = vector.load %arg5[%c2, %c0_32, %c0_33] : memref<5x2x128xf32, #tpu.memory_space<vmem>>, vector<1x2x128xf32>
    %53 = vector.shape_cast %52 : vector<1x2x128xf32> to vector<2x128xf32>
    %54 = arith.truncf %51 : vector<16x128xf32> to vector<16x128xbf16>
    %c2_34 = arith.constant 2 : index
    %c0_35 = arith.constant 0 : index
    %c0_36 = arith.constant 0 : index
    %55 = vector.load %arg3[%c2_34, %c0_35, %c0_36] : memref<5x128x128xbf16, #tpu.memory_space<vmem>>, vector<1x128x128xbf16>
    %56 = vector.shape_cast %55 : vector<1x128x128xbf16> to vector<128x128xbf16>
    %cst_37 = arith.constant dense<0.000000e+00> : vector<16x128xf32>
    %57 = tpu.matmul %54, %56, %cst_37 {dimension_numbers = #tpu.dot_dimension_numbers<[1], [0], [0], [1], [0, 0, 1, 1], [], []>} : vector<16x128xbf16>, vector<128x128xbf16>, vector<16x128xf32> -> vector<16x128xf32>
    %58 = vector.extract_strided_slice %53 {offsets = [0, 0], sizes = [1, 128], strides = [1, 1]} : vector<2x128xf32> to vector<1x128xf32>
    %59 = vector.broadcast %58 : vector<1x128xf32> to vector<16x128xf32>
    %60 = arith.addf %57, %59 : vector<16x128xf32>
    %cst_38 = arith.constant 0.000000e+00 : f32
    %61 = vector.broadcast %cst_38 : f32 to vector<16x128xf32>
    %62 = arith.maximumf %60, %61 : vector<16x128xf32>
    %63 = arith.truncf %62 : vector<16x128xf32> to vector<16x128xbf16>
    %c2_39 = arith.constant 2 : index
    %c0_40 = arith.constant 0 : index
    %c0_41 = arith.constant 0 : index
    %64 = vector.load %arg4[%c2_39, %c0_40, %c0_41] : memref<5x128x128xbf16, #tpu.memory_space<vmem>>, vector<1x128x128xbf16>
    %65 = vector.shape_cast %64 : vector<1x128x128xbf16> to vector<128x128xbf16>
    %cst_42 = arith.constant dense<0.000000e+00> : vector<16x128xf32>
    %66 = tpu.matmul %63, %65, %cst_42 {dimension_numbers = #tpu.dot_dimension_numbers<[1], [0], [0], [1], [0, 0, 1, 1], [], []>} : vector<16x128xbf16>, vector<128x128xbf16>, vector<16x128xf32> -> vector<16x128xf32>
    %67 = vector.extract_strided_slice %53 {offsets = [1, 0], sizes = [1, 128], strides = [1, 1]} : vector<2x128xf32> to vector<1x128xf32>
    %68 = vector.broadcast %67 : vector<1x128xf32> to vector<16x128xf32>
    %69 = arith.addf %66, %68 : vector<16x128xf32>
    %cst_43 = arith.constant 0.000000e+00 : f32
    %70 = vector.broadcast %cst_43 : f32 to vector<16x128xf32>
    %71 = arith.maximumf %69, %70 : vector<16x128xf32>
    %72 = arith.truncf %71 : vector<16x128xf32> to vector<16x128xbf16>
    %73 = arith.extf %72 : vector<16x128xbf16> to vector<16x128xf32>
    %cst_44 = arith.constant dense<0.000000e+00> : vector<16x128xf32>
    %74 = tpu.matmul %1, %73, %cst_44 {dimension_numbers = #tpu.dot_dimension_numbers<[1], [0], [0], [1], [0, 0, 1, 1], [], []>} : vector<16x16xf32>, vector<16x128xf32>, vector<16x128xf32> -> vector<16x128xf32>
    %c3 = arith.constant 3 : index
    %c0_45 = arith.constant 0 : index
    %c0_46 = arith.constant 0 : index
    %75 = vector.load %arg5[%c3, %c0_45, %c0_46] : memref<5x2x128xf32, #tpu.memory_space<vmem>>, vector<1x2x128xf32>
    %76 = vector.shape_cast %75 : vector<1x2x128xf32> to vector<2x128xf32>
    %77 = arith.truncf %74 : vector<16x128xf32> to vector<16x128xbf16>
    %c3_47 = arith.constant 3 : index
    %c0_48 = arith.constant 0 : index
    %c0_49 = arith.constant 0 : index
    %78 = vector.load %arg3[%c3_47, %c0_48, %c0_49] : memref<5x128x128xbf16, #tpu.memory_space<vmem>>, vector<1x128x128xbf16>
    %79 = vector.shape_cast %78 : vector<1x128x128xbf16> to vector<128x128xbf16>
    %cst_50 = arith.constant dense<0.000000e+00> : vector<16x128xf32>
    %80 = tpu.matmul %77, %79, %cst_50 {dimension_numbers = #tpu.dot_dimension_numbers<[1], [0], [0], [1], [0, 0, 1, 1], [], []>} : vector<16x128xbf16>, vector<128x128xbf16>, vector<16x128xf32> -> vector<16x128xf32>
    %81 = vector.extract_strided_slice %76 {offsets = [0, 0], sizes = [1, 128], strides = [1, 1]} : vector<2x128xf32> to vector<1x128xf32>
    %82 = vector.broadcast %81 : vector<1x128xf32> to vector<16x128xf32>
    %83 = arith.addf %80, %82 : vector<16x128xf32>
    %cst_51 = arith.constant 0.000000e+00 : f32
    %84 = vector.broadcast %cst_51 : f32 to vector<16x128xf32>
    %85 = arith.maximumf %83, %84 : vector<16x128xf32>
    %86 = arith.truncf %85 : vector<16x128xf32> to vector<16x128xbf16>
    %c3_52 = arith.constant 3 : index
    %c0_53 = arith.constant 0 : index
    %c0_54 = arith.constant 0 : index
    %87 = vector.load %arg4[%c3_52, %c0_53, %c0_54] : memref<5x128x128xbf16, #tpu.memory_space<vmem>>, vector<1x128x128xbf16>
    %88 = vector.shape_cast %87 : vector<1x128x128xbf16> to vector<128x128xbf16>
    %cst_55 = arith.constant dense<0.000000e+00> : vector<16x128xf32>
    %89 = tpu.matmul %86, %88, %cst_55 {dimension_numbers = #tpu.dot_dimension_numbers<[1], [0], [0], [1], [0, 0, 1, 1], [], []>} : vector<16x128xbf16>, vector<128x128xbf16>, vector<16x128xf32> -> vector<16x128xf32>
    %90 = vector.extract_strided_slice %76 {offsets = [1, 0], sizes = [1, 128], strides = [1, 1]} : vector<2x128xf32> to vector<1x128xf32>
    %91 = vector.broadcast %90 : vector<1x128xf32> to vector<16x128xf32>
    %92 = arith.addf %89, %91 : vector<16x128xf32>
    %cst_56 = arith.constant 0.000000e+00 : f32
    %93 = vector.broadcast %cst_56 : f32 to vector<16x128xf32>
    %94 = arith.maximumf %92, %93 : vector<16x128xf32>
    %95 = arith.truncf %94 : vector<16x128xf32> to vector<16x128xbf16>
    %96 = arith.extf %95 : vector<16x128xbf16> to vector<16x128xf32>
    %cst_57 = arith.constant dense<0.000000e+00> : vector<16x128xf32>
    %97 = tpu.matmul %1, %96, %cst_57 {dimension_numbers = #tpu.dot_dimension_numbers<[1], [0], [0], [1], [0, 0, 1, 1], [], []>} : vector<16x16xf32>, vector<16x128xf32>, vector<16x128xf32> -> vector<16x128xf32>
    %c4 = arith.constant 4 : index
    %c0_58 = arith.constant 0 : index
    %c0_59 = arith.constant 0 : index
    %98 = vector.load %arg5[%c4, %c0_58, %c0_59] : memref<5x2x128xf32, #tpu.memory_space<vmem>>, vector<1x2x128xf32>
    %99 = vector.shape_cast %98 : vector<1x2x128xf32> to vector<2x128xf32>
    %100 = arith.truncf %97 : vector<16x128xf32> to vector<16x128xbf16>
    %c4_60 = arith.constant 4 : index
    %c0_61 = arith.constant 0 : index
    %c0_62 = arith.constant 0 : index
    %101 = vector.load %arg3[%c4_60, %c0_61, %c0_62] : memref<5x128x128xbf16, #tpu.memory_space<vmem>>, vector<1x128x128xbf16>
    %102 = vector.shape_cast %101 : vector<1x128x128xbf16> to vector<128x128xbf16>
    %cst_63 = arith.constant dense<0.000000e+00> : vector<16x128xf32>
    %103 = tpu.matmul %100, %102, %cst_63 {dimension_numbers = #tpu.dot_dimension_numbers<[1], [0], [0], [1], [0, 0, 1, 1], [], []>} : vector<16x128xbf16>, vector<128x128xbf16>, vector<16x128xf32> -> vector<16x128xf32>
    %104 = vector.extract_strided_slice %99 {offsets = [0, 0], sizes = [1, 128], strides = [1, 1]} : vector<2x128xf32> to vector<1x128xf32>
    %105 = vector.broadcast %104 : vector<1x128xf32> to vector<16x128xf32>
    %106 = arith.addf %103, %105 : vector<16x128xf32>
    %cst_64 = arith.constant 0.000000e+00 : f32
    %107 = vector.broadcast %cst_64 : f32 to vector<16x128xf32>
    %108 = arith.maximumf %106, %107 : vector<16x128xf32>
    %109 = arith.truncf %108 : vector<16x128xf32> to vector<16x128xbf16>
    %c4_65 = arith.constant 4 : index
    %c0_66 = arith.constant 0 : index
    %c0_67 = arith.constant 0 : index
    %110 = vector.load %arg4[%c4_65, %c0_66, %c0_67] : memref<5x128x128xbf16, #tpu.memory_space<vmem>>, vector<1x128x128xbf16>
    %111 = vector.shape_cast %110 : vector<1x128x128xbf16> to vector<128x128xbf16>
    %cst_68 = arith.constant dense<0.000000e+00> : vector<16x128xf32>
    %112 = tpu.matmul %109, %111, %cst_68 {dimension_numbers = #tpu.dot_dimension_numbers<[1], [0], [0], [1], [0, 0, 1, 1], [], []>} : vector<16x128xbf16>, vector<128x128xbf16>, vector<16x128xf32> -> vector<16x128xf32>
    %113 = vector.extract_strided_slice %99 {offsets = [1, 0], sizes = [1, 128], strides = [1, 1]} : vector<2x128xf32> to vector<1x128xf32>
    %114 = vector.broadcast %113 : vector<1x128xf32> to vector<16x128xf32>
    %115 = arith.addf %112, %114 : vector<16x128xf32>
    %cst_69 = arith.constant 0.000000e+00 : f32
    %116 = vector.broadcast %cst_69 : f32 to vector<16x128xf32>
    %117 = arith.maximumf %115, %116 : vector<16x128xf32>
    %118 = arith.truncf %117 : vector<16x128xf32> to vector<16x128xbf16>
    %c0_70 = arith.constant 0 : index
    %c0_71 = arith.constant 0 : index
    %119 = vector.load %arg6[%c0_70, %c0_71] : memref<128x128xbf16, #tpu.memory_space<vmem>>, vector<128x128xbf16>
    %cst_72 = arith.constant dense<0.000000e+00> : vector<16x128xf32>
    %120 = tpu.matmul %118, %119, %cst_72 {dimension_numbers = #tpu.dot_dimension_numbers<[1], [0], [0], [1], [0, 0, 1, 1], [], []>} : vector<16x128xbf16>, vector<128x128xbf16>, vector<16x128xf32> -> vector<16x128xf32>
    %c0_73 = arith.constant 0 : index
    %c0_74 = arith.constant 0 : index
    %121 = vector.load %arg7[%c0_73, %c0_74] : memref<1x128xf32, #tpu.memory_space<vmem>>, vector<1x128xf32>
    %122 = vector.broadcast %121 : vector<1x128xf32> to vector<16x128xf32>
    %123 = arith.addf %120, %122 : vector<16x128xf32>
    %cst_75 = arith.constant 0.000000e+00 : f32
    %124 = vector.broadcast %cst_75 : f32 to vector<16x128xf32>
    %125 = arith.maximumf %123, %124 : vector<16x128xf32>
    %126 = arith.truncf %125 : vector<16x128xf32> to vector<16x128xbf16>
    %c0_76 = arith.constant 0 : index
    %c0_77 = arith.constant 0 : index
    %127 = vector.load %arg8[%c0_76, %c0_77] : memref<128x128xbf16, #tpu.memory_space<vmem>>, vector<128x128xbf16>
    %cst_78 = arith.constant dense<0.000000e+00> : vector<16x128xf32>
    %128 = tpu.matmul %126, %127, %cst_78 {dimension_numbers = #tpu.dot_dimension_numbers<[1], [0], [0], [1], [0, 0, 1, 1], [], []>} : vector<16x128xbf16>, vector<128x128xbf16>, vector<16x128xf32> -> vector<16x128xf32>
    %c0_79 = arith.constant 0 : index
    %c0_80 = arith.constant 0 : index
    %129 = vector.load %arg9[%c0_79, %c0_80] : memref<1x128xf32, #tpu.memory_space<vmem>>, vector<1x128xf32>
    %130 = vector.broadcast %129 : vector<1x128xf32> to vector<16x128xf32>
    %131 = arith.addf %128, %130 : vector<16x128xf32>
    %cst_81 = arith.constant dense<0xFF800000> : vector<16xf32>
    %132 = vector.multi_reduction <maximumf>, %131, %cst_81 [1] : vector<16x128xf32> to vector<16xf32>
    %133 = vector.shape_cast %132 : vector<16xf32> to vector<16x1xf32>
    %134 = vector.broadcast %133 : vector<16x1xf32> to vector<16x128xf32>
    %135 = arith.subf %131, %134 : vector<16x128xf32>
    %136 = math.exp %135 : vector<16x128xf32>
    %cst_82 = arith.constant dense<0.000000e+00> : vector<16xf32>
    %137 = vector.multi_reduction <add>, %136, %cst_82 [1] : vector<16x128xf32> to vector<16xf32>
    %138 = vector.shape_cast %137 : vector<16xf32> to vector<16x1xf32>
    %139 = math.log %138 : vector<16x1xf32>
    %140 = vector.broadcast %139 : vector<16x1xf32> to vector<16x128xf32>
    %141 = arith.subf %135, %140 : vector<16x128xf32>
    %c0_83 = arith.constant 0 : index
    %c0_84 = arith.constant 0 : index
    %c0_85 = arith.constant 0 : index
    %142 = vector.load %arg10[%c0_83, %c0_84, %c0_85] : memref<1x16x128xf32, #tpu.memory_space<vmem>>, vector<1x16x128xf32>
    %143 = vector.shape_cast %142 : vector<1x16x128xf32> to vector<16x128xf32>
    %144 = vector.shape_cast %141 : vector<16x128xf32> to vector<1x16x128xf32>
    tpu.vector_store %arg10[%c0_83, %c0_84, %c0_85], %144 {strides = array<i32>} : memref<1x16x128xf32, #tpu.memory_space<vmem>>, vector<1x16x128xf32>,
    return
  }
  func.func @transform_0(%arg0: i32) -> (i32, i32, i32) {
    %c0_i32 = arith.constant 0 : i32
    %c0_i32_0 = arith.constant 0 : i32
    %c0_i32_1 = arith.constant 0 : i32
    return %arg0, %c0_i32, %c0_i32_0 : i32, i32, i32
  }
  func.func @transform_1(%arg0: i32) -> (i32, i32, i32) {
    %c0_i32 = arith.constant 0 : i32
    %c0_i32_0 = arith.constant 0 : i32
    %c0_i32_1 = arith.constant 0 : i32
    return %arg0, %c0_i32, %c0_i32_0 : i32, i32, i32
  }
  func.func @transform_2(%arg0: i32) -> (i32, i32, i32) {
    %c0_i32 = arith.constant 0 : i32
    %c0_i32_0 = arith.constant 0 : i32
    %c0_i32_1 = arith.constant 0 : i32
    %c0_i32_2 = arith.constant 0 : i32
    return %c0_i32, %c0_i32_0, %c0_i32_1 : i32, i32, i32
  }
  func.func @transform_3(%arg0: i32) -> (i32, i32, i32) {
    %c0_i32 = arith.constant 0 : i32
    %c0_i32_0 = arith.constant 0 : i32
    %c0_i32_1 = arith.constant 0 : i32
    %c0_i32_2 = arith.constant 0 : i32
    return %c0_i32, %c0_i32_0, %c0_i32_1 : i32, i32, i32
  }
  func.func @transform_4(%arg0: i32) -> (i32, i32, i32) {
    %c0_i32 = arith.constant 0 : i32
    %c0_i32_0 = arith.constant 0 : i32
    %c0_i32_1 = arith.constant 0 : i32
    %c0_i32_2 = arith.constant 0 : i32
    return %c0_i32, %c0_i32_0, %c0_i32_1 : i32, i32, i32
  }
  func.func @transform_5(%arg0: i32) -> (i32, i32) {
    %c0_i32 = arith.constant 0 : i32
    %c0_i32_0 = arith.constant 0 : i32
    %c0_i32_1 = arith.constant 0 : i32
    return %c0_i32, %c0_i32_0 : i32, i32
  }
  func.func @transform_6(%arg0: i32) -> (i32, i32) {
    %c0_i32 = arith.constant 0 : i32
    %c0_i32_0 = arith.constant 0 : i32
    %c0_i32_1 = arith.constant 0 : i32
    return %c0_i32, %c0_i32_0 : i32, i32
  }
  func.func @transform_7(%arg0: i32) -> (i32, i32) {
    %c0_i32 = arith.constant 0 : i32
    %c0_i32_0 = arith.constant 0 : i32
    %c0_i32_1 = arith.constant 0 : i32
    return %c0_i32, %c0_i32_0 : i32, i32
  }
  func.func @transform_8(%arg0: i32) -> (i32, i32) {
    %c0_i32 = arith.constant 0 : i32
    %c0_i32_0 = arith.constant 0 : i32
    %c0_i32_1 = arith.constant 0 : i32
    return %c0_i32, %c0_i32_0 : i32, i32
  }
  func.func @transform_9(%arg0: i32) -> (i32, i32, i32) {
    %c0_i32 = arith.constant 0 : i32
    %c0_i32_0 = arith.constant 0 : i32
    %c0_i32_1 = arith.constant 0 : i32
    return %arg0, %c0_i32, %c0_i32_0 : i32, i32, i32
  }
}

</mosaic_0001>

<bundles_post_ra>
// kernel: imbgnn_forward.1
= control target key start
LH: loop header
LB: loop body
LE: loop exit
PB: predicated region body
PF: predicated region fallthrough
CT: control target
= control target key end

     0   :  { %14 = vsyncpa [#allocation3], 0  ;;  %s3418_s0 = inlined_call_operand.vmem [shape: f32[4,16,16], index: 0, kind: input, shape index: {}]   ;;  %s3419_s1 = inlined_call_operand.vmem [shape: bf16[4,16,128], index: 1, kind: input, shape index: {}]   ;;  %s3420_s2 = inlined_call_operand.hbm [shape: bf16[5,128,128], index: 2, kind: input, shape index: {}]   ;;  %s3421_s3 = inlined_call_operand.hbm [shape: bf16[5,128,128], index: 3, kind: input, shape index: {}]   ;;  %s3422_s4 = inlined_call_operand.vmem [shape: f32[5,2,128], index: 4, kind: input, shape index: {}]   ;;  %s3423_s5 = inlined_call_operand.vmem [shape: bf16[128,128], index: 5, kind: input, shape index: {}]   ;;  %s3424_s6 = inlined_call_operand.vmem [shape: f32[1,128], index: 6, kind: input, shape index: {}]   ;;  %s3425_s7 = inlined_call_operand.hbm [shape: bf16[128,128], index: 7, kind: input, shape index: {}]   ;;  %s3426_s8 = inlined_call_operand.vmem [shape: f32[1,128], index: 8, kind: input, shape index: {}]   ;;  %s3427_s9 = inlined_call_operand.vmem [shape: f32[4,16,128], index: 9, kind: output, shape index: {}]  }
   0x1   :  { %15 = vsyncpa [#allocation5], 0  ;;  %s3123_s30 = smov 0  }
   0x2 LB: > { %s3129_s10 = sadd.s32 4294967295, %s3064_s30   ;;  %p2285_p0 = scmp.ge.s32.totalorder %s3064_s30, 1  ;;  %s3064_s30 = sphi %s3123_s30, %s21_s30  }
   0x3   : > { %p251_p1 = scmp.lt.s32.totalorder %s3064_s30, 5  ;;  %p2846_p2 = scmp.eq.s32.totalorder %s3129_s10, 0 }
   0x4   : > { %s3066_s12 = smov [#allocation4]   ;;  %s3067_s14 = smov [#allocation2]  }
   0x5   : > { %p3134_p3 = pnand %p2285_p0, %p251_p1  ;;  %s276_s13 = sshll.u32 %s3066_s12, 4  ;;  %s277_s13 = int_to_ptr.vmem [resolvable:$true] %s276_s13 }
   0x6   : > { %s263_s15 = sshll.u32 %s3067_s14, 4  ;;  %s3068_s17 = smov [#allocation6]   ;;  %s264_s15 = int_to_ptr.vmem [resolvable:$true] %s263_s15 }
   0x7   : > { %p2836_p4 = pneg %p3134_p3  ;;  %s298_s18 = sshll.u32 %s3068_s17, 4  ;;  %s3146_s18 = int_to_ptr.vmem [resolvable:$true] %s298_s18 }
   0x8   : > { %s2983_s19 = scalar_lea.vmem %s277_s13, 5120  ;;  %p2991_p10 = scmp.lt.s32.totalorder %s277_s13, %s277_s13 }
   0x9   : > { %p3142_p5 = pnand %p2846_p2, %p2836_p4  ;;  %p2984_p7 = scmp.ne.s32.totalorder %s277_s13, %s2983_s19 }
   0xa   : > { %p2992_p11 = scmp.lt.s32.totalorder %s2983_s19, %s2983_s19 }
   0xb   : > { %p2974_p6 = pneg %p3142_p5 }
   0xc   : > { %p2993_p12 = por %p2992_p11, %p2991_p10 }
   0xd   : > { %p2986_p8 = pnand %p2984_p7, %p2974_p6 }
   0xf   : > { %p2987_p9 = pneg %p2986_p8 }
  0x11   : > { %p2994_p13 = pnand %p2993_p12, %p2987_p9 }
  0x13   : > { %2997 = shalt.err (!%p2994_p13)
}
  0x14   : > { %s3069_s20 = smov 64   ;;  %s3070_s21 = smov 4  }
  0x15   : > { %2842 = dma.hbm_to_vmem [thread:$0]  (!%p3142_p5), %s3421_s3, 5120, %s277_s13, [#allocation5], %s3069_s20, %s3069_s20, %s3070_s21  }
  0x16   : > { %s3009_s24 = scalar_lea.vmem %s264_s15, 5120  ;;  %p3017_p7 = scmp.lt.s32.totalorder %s264_s15, %s264_s15 }
  0x17   : > { %p3010_p0 = scmp.ne.s32.totalorder %s264_s15, %s3009_s24  ;;  %p3018_p8 = scmp.lt.s32.totalorder %s3009_s24, %s3009_s24 }
  0x19   : > { %p3012_p1 = pnand %p3010_p0, %p2974_p6  ;;  %p3019_p10 = por %p3018_p8, %p3017_p7 }
  0x1b   : > { %p3013_p4 = pneg %p3012_p1 }
  0x1d   : > { %p3020_p9 = pnand %p3019_p10, %p3013_p4 }
  0x1f   : > { %3023 = shalt.err (!%p3020_p9)
}
  0x20   : > { %2839 = dma.hbm_to_vmem [thread:$0]  (!%p3142_p5), %s3420_s2, 5120, %s264_s15, [#allocation3], %s3069_s20, %s3069_s20, %s3070_s21  }
  0x21   : > { %s3035_s27 = scalar_lea.vmem %s3146_s18, 1024  ;;  %p3043_p0 = scmp.lt.s32.totalorder %s3146_s18, %s3146_s18 }
  0x22   : > { %p3036_p11 = scmp.ne.s32.totalorder %s3146_s18, %s3035_s27  ;;  %p3044_p1 = scmp.lt.s32.totalorder %s3035_s27, %s3035_s27 }
  0x24   : > { %p3038_p12 = pnand %p3036_p11, %p2974_p6  ;;  %p3045_p4 = por %p3044_p1, %p3043_p0 }
  0x26   : > { %p3039_p13 = pneg %p3038_p12 }
  0x28   : > { %p3046_p7 = pnand %p3045_p4, %p3039_p13 }
  0x2a   : > { %3049 = shalt.err (!%p3046_p7)
}
  0x2b   : > { %2845 = dma.hbm_to_vmem [thread:$0]  (!%p3142_p5), %s3425_s7, 1024, %s3146_s18, [#allocation5], %s3069_s20, %s3069_s20, %s3070_s21  }
  0x2c   : > { %333 = sbr.rel (%p3134_p3) target bundleno = 3818 (0xeea), region = 56 }
  0x31   : > { %3055 = dma.done.wait (%p2846_p2), [#allocation3], 5120  }
  0x32   : > { %3057 = vsyncadd (%p2846_p2), [#allocation3], 4294962176 }
  0x33   : > { %3059 = dma.done.wait (%p2846_p2), [#allocation5], 6144  }
  0x34   : > { %3061 = vsyncadd (%p2846_p2), [#allocation5], 4294961152  ;;  %p382_p6 = scmp.lt.s32.totalorder %s3129_s10, 3  ;;  %v3071_v0 = vmov 0.0   ;;  %vm404_vm0 = vcmask 130048   ;;  %v2867_v5 = vld [vmem:[#allocation2 + $0x38] sm:$0xff]   ;;  %v504_v25 = vlaneseq }
  0x35   : > { %2556 = vmatprep.subr.bf16.mxu1 %v3071_v0  ;;  %v2868_v6 = vld [vmem:[#allocation2 + $0x30] sm:$0xff]   ;;  %v2869_v8 = vld [vmem:[#allocation2 + $0x28] sm:$0xff]   ;;  %v2870_v9 = vld [vmem:[#allocation2 + $0x20] sm:$0xff]   ;;  %vm3072_vm1 = vmmov 0  }
  0x36   : > { %s3431_s10 = smov (!%p382_p6, %s3129_s10), 3  ;;  %2557 = vmatpush3.bf16.msra.mxu1 %v2867_v5  ;;  %v2871_v10 = vld [vmem:[#allocation2 + $0x18] sm:$0xff]   ;;  %v2872_v11 = vld [vmem:[#allocation2 + $0x10] sm:$0xff]   ;;  %v2873_v12 = vld [vmem:[#allocation2 + $0x8] sm:$0xff]   ;;  %2572 = vmatprep.mubr.msk.bf16.mxu1 %vm3072_vm1, %v3071_v0  ;;  %v505_v26 = vshrl.u32 %v504_v25, 7 }
  0x37   : > { %s2415_s11 = sshll.u32 %s3431_s10, 3  ;;  %s2414_s12 = sshll.u32 %s3431_s10, 4  ;;  %2558 = vmatprep.subr.bf16.mxu1 %v3071_v0  ;;  %v2874_v13 = vld [vmem:[#allocation2] sm:$0xff]   ;;  %v2875_v14 = vld [vmem:[#allocation4 + $0x38] sm:$0xff]   ;;  %v2876_v15 = vld [vmem:[#allocation4 + $0x30] sm:$0xff]  }
  0x38   : > { %s391_s15 = scalar_lea.vmem %s3419_s1, %s2415_s11  ;;  %s3204_s18 = scalar_lea.vmem %s3418_s0, %s2414_s12  ;;  %v2877_v16 = vld [vmem:[#allocation4 + $0x28] sm:$0xff]   ;;  %v2878_v17 = vld [vmem:[#allocation4 + $0x20] sm:$0xff]   ;;  %v2879_v18 = vld [vmem:[#allocation4 + $0x18] sm:$0xff]   ;;  %v3238_v27 = vsub.s32 0, %v505_v26  ;;  %v3253_v46 = vsub.s32 1, %v505_v26 }
  0x39   : > { %v2418_v1 = vld [vmem:[%s391_s15] sm:$0xff]   ;;  %v3212_v7 = vld [vmem:[%s3204_s18 + $0x8] sm:$0xff]  ;;  %v2880_v22 = vld [vmem:[#allocation4 + $0x10] sm:$0xff]   ;;  %s396_s15 = scalar_lea.vmem %s3427_s9, %s2414_s12 }
  0x3a   : > { %v3207_v2 = vld [vmem:[%s3204_s18] sm:$0xff]  ;;  %v2419_v3 = vunpack.c.l.bf16 %v2418_v1  ;;  %v2420_v4 = vunpack.c.h.bf16 %v2418_v1  ;;  %2559 = vmatpush3.bf16.msra.mxu1 %v2868_v6  ;;  %v2881_v23 = vld [vmem:[#allocation4 + $0x8] sm:$0xff]   ;;  %v2883_v39 = vld [vmem:[#allocation2 + $0x78] sm:$0xff]  }
  0x3b   : > { %2553 = vmatprep.mubr.msk.f32.mxu0 %vm404_vm0, %v3207_v2  ;;  %2560 = vmatprep.subr.bf16.mxu1 %v3071_v0  ;;  %v2882_v24 = vld [vmem:[#allocation4] sm:$0xff]   ;;  %v2884_v40 = vld [vmem:[#allocation2 + $0x70] sm:$0xff]   ;;  %v2885_v41 = vld [vmem:[#allocation2 + $0x68] sm:$0xff]  }
  0x3c   : > { %2549 = vmatprep.subr.mxu0 %v2420_v4  ;;  %v486_v28 = vld [vmem:[%s3422_s4] sm:$0x3]  ;;  %v2887_v43 = vld [vmem:[#allocation2 + $0x58] sm:$0xff]   ;;  %v2888_v44 = vld [vmem:[#allocation2 + $0x50] sm:$0xff]  }
  0x3d   : > { %2550 = vmatpush3.msra.mxu0 %v2420_v4  ;;  %v507_v29 = vrot.slane %v486_v28, %v3238_v27  ;;  %v2886_v42 = vld [vmem:[#allocation2 + $0x60] sm:$0xff]   ;;  %v2889_v45 = vld [vmem:[#allocation2 + $0x48] sm:$0xff]   ;;  %v619_v47 = vrot.slane %v486_v28, %v3253_v46  ;;  %v2891_v60 = vld [vmem:[#allocation4 + $0x78] sm:$0xff]  }
  0x3e   : > { %2551 = vmatprep.subr.mxu0 %v2419_v3  ;;  %2561 = vmatpush3.bf16.msra.mxu1 %v2869_v8  ;;  %v2890_v59 = vld [vmem:[#allocation2 + $0x40] sm:$0xff]   ;;  %v2892_v61 = vld [vmem:[#allocation4 + $0x70] sm:$0xff]   ;;  %v2893_v62 = vld [vmem:[#allocation4 + $0x68] sm:$0xff]  }
  0x3f   : > { %2552 = vmatpush3.msra.mxu0 %v2419_v3  ;;  %2562 = vmatprep.subr.bf16.mxu1 %v3071_v0  ;;  %v2894_v63 = vld [vmem:[#allocation4 + $0x60] sm:$0xff]   ;;  %v2895_v1 = vld [vmem:[#allocation4 + $0x58] sm:$0xff]   ;;  %v2896_v6 = vld [vmem:[#allocation4 + $0x50] sm:$0xff]  }
  0x40   : > { %2554 = vmatmul.mubr.msk.f32.vlgmr.msra.gmra.mxu0 %vm404_vm0, %v3212_v7  ;;  %2576 = vmatprep.subr.bf16.mxu0 %v3071_v0  ;;  %v2897_v8 = vld [vmem:[#allocation4 + $0x48] sm:$0xff]   ;;  %v2903_v25 = vld [vmem:[#allocation2 + $0x98] sm:$0xff]   ;;  %v2904_v26 = vld [vmem:[#allocation2 + $0x90] sm:$0xff]  }
  0x41   : > { %2592 = vmatprep.mubr.msk.bf16.mxu0 %vm3072_vm1, %v3071_v0  ;;  %2577 = vmatpush3.bf16.msra.mxu0 %v2875_v14  ;;  %v2905_v28 = vld [vmem:[#allocation2 + $0x88] sm:$0xff]  }
  0x42   : > { %2563 = vmatpush3.bf16.msra.mxu1 %v2870_v9  ;;  %2578 = vmatprep.subr.bf16.mxu0 %v3071_v0  ;;  %v2898_v9 = vld [vmem:[#allocation4 + $0x40] sm:$0xff]  }
  0x43   : > { %2564 = vmatprep.subr.bf16.mxu1 %v3071_v0 }
  0x45   : > { %2579 = vmatpush3.bf16.msra.mxu0 %v2876_v15 }
  0x46   : > { %2565 = vmatpush3.bf16.msra.mxu1 %v2871_v10  ;;  %2580 = vmatprep.subr.bf16.mxu0 %v3071_v0  ;;  %v2320_v10 = vld [vmem:[%s3422_s4 + $0x2] sm:$0x3] }
  0x47   : > { %2566 = vmatprep.subr.bf16.mxu1 %v3071_v0 }
  0x49   : > { %2581 = vmatpush3.bf16.msra.mxu0 %v2877_v16 }
  0x4a   : > { %2567 = vmatpush3.bf16.msra.mxu1 %v2872_v11  ;;  %2582 = vmatprep.subr.bf16.mxu0 %v3071_v0  ;;  %v812_v11 = vrot.slane %v2320_v10, %v3238_v27 }
  0x4b   : > { %2568 = vmatprep.subr.bf16.mxu1 %v3071_v0 }
  0x4d   : > { %2583 = vmatpush3.bf16.msra.mxu0 %v2878_v17 }
  0x4e   : > { %2569 = vmatpush3.bf16.msra.mxu1 %v2873_v12  ;;  %2584 = vmatprep.subr.bf16.mxu0 %v3071_v0 }
  0x4f   : > { %2570 = vmatprep.subr.bf16.mxu1 %v3071_v0 }
  0x51   : > { %2585 = vmatpush3.bf16.msra.mxu0 %v2879_v18 }
  0x52   : > { %2571 = vmatpush3.bf16.msra.mxu1 %v2874_v13  ;;  %2586 = vmatprep.subr.bf16.mxu0 %v3071_v0 }
  0x55   : > { %2587 = vmatpush3.bf16.msra.mxu0 %v2880_v22  ;;  %v2900_v22 = vld [vmem:[#allocation2 + $0xb0] sm:$0xff]  }
  0x56   : > { %2588 = vmatprep.subr.bf16.mxu0 %v3071_v0 }
  0x59   : > { %2589 = vmatpush3.bf16.msra.mxu0 %v2881_v23  ;;  %v2901_v23 = vld [vmem:[#allocation2 + $0xa8] sm:$0xff]  }
  0x5a   : > { %2590 = vmatprep.subr.bf16.mxu0 %v3071_v0 }
  0x5d   : > { %2591 = vmatpush3.bf16.msra.mxu0 %v2882_v24  ;;  %v2902_v24 = vld [vmem:[#allocation2 + $0xa0] sm:$0xff]  }
  0x5e   : > { %2603 = vmatprep.subr.bf16.mxu0 %v3071_v0 }
 0x100   : > { %v2555_v19 = vpop.f32.mrf.mxu0 }
 0x102   : > { %v477_v20 = vpop.f32.mrf.mxu0 }
 0x103   : > { %v487_v21 = vpack.c.bf16 %v2555_v19, %v477_v20 }
 0x105   : > { %2573 = vmatmul.mubr.bf16.vlgmr.msra.gmra.mxu1 %v487_v21  ;;  %v2899_v21 = vld [vmem:[#allocation2 + $0xb8] sm:$0xff]  }
 0x106   : > { %2600 = vmatprep.mubr.msk.f32.mxu1 %vm404_vm0, %v3207_v2 }
 0x1c5   : > { %v590_v30 = vpop.f32.mrf.mxu1 }
 0x1c6   : > { %v591_v32 = vadd.f32 %v590_v30, %v507_v29 }
 0x1c7   : > { %v2574_v31 = vpop.f32.mrf.mxu1 }
 0x1c8   : > { %v597_v36 = vmax.f32 %v591_v32, 0.0 }
 0x1c9   : > { %v593_v33 = vpop.f32.mrf.mxu1 }
 0x1ca   : > { %v594_v34 = vadd.f32 %v593_v33, %v507_v29  ;;  %v925_v29 = vrot.slane %v2320_v10, %v3253_v46  ;;  %v2921_v10 = vld [vmem:[#allocation2 + $0xc8] sm:$0xff]  }
 0x1cb   : > { %v2575_v35 = vpop.f32.mrf.mxu1 }
 0x1cc   : > { %v598_v37 = vmax.f32 %v594_v34, 0.0 }
 0x1ce   : > { %v599_v38 = vpack.c.bf16 %v598_v37, %v597_v36 }
 0x1d0   : > { %2593 = vmatmul.mubr.bf16.vlgmr.msra.gmra.mxu0 %v599_v38 }
 0x1d1   : > { %2619 = vmatprep.mubr.msk.bf16.mxu0 %vm3072_vm1, %v3071_v0  ;;  %2604 = vmatpush3.bf16.msra.mxu0 %v2883_v39 }
 0x1d2   : > { %2605 = vmatprep.subr.bf16.mxu0 %v3071_v0 }
 0x1d5   : > { %2606 = vmatpush3.bf16.msra.mxu0 %v2884_v40 }
 0x1d6   : > { %2607 = vmatprep.subr.bf16.mxu0 %v3071_v0 }
 0x1d9   : > { %2608 = vmatpush3.bf16.msra.mxu0 %v2885_v41  ;;  %v2906_v41 = vld [vmem:[#allocation2 + $0x80] sm:$0xff]  }
 0x1da   : > { %2609 = vmatprep.subr.bf16.mxu0 %v3071_v0 }
 0x1dd   : > { %2610 = vmatpush3.bf16.msra.mxu0 %v2886_v42  ;;  %v2907_v42 = vld [vmem:[#allocation4 + $0xb8] sm:$0xff]  }
 0x1de   : > { %2611 = vmatprep.subr.bf16.mxu0 %v3071_v0 }
 0x1e1   : > { %2612 = vmatpush3.bf16.msra.mxu0 %v2887_v43  ;;  %v2908_v43 = vld [vmem:[#allocation4 + $0xb0] sm:$0xff]  }
 0x1e2   : > { %2613 = vmatprep.subr.bf16.mxu0 %v3071_v0 }
 0x1e5   : > { %2614 = vmatpush3.bf16.msra.mxu0 %v2888_v44  ;;  %v2909_v44 = vld [vmem:[#allocation4 + $0xa8] sm:$0xff]  }
 0x1e6   : > { %2615 = vmatprep.subr.bf16.mxu0 %v3071_v0 }
 0x1e9   : > { %2616 = vmatpush3.bf16.msra.mxu0 %v2889_v45  ;;  %v2910_v45 = vld [vmem:[#allocation4 + $0xa0] sm:$0xff]  }
 0x1ea   : > { %2617 = vmatprep.subr.bf16.mxu0 %v3071_v0 }
 0x1ed   : > { %2618 = vmatpush3.bf16.msra.mxu0 %v2890_v59 }
 0x290   : > { %v702_v48 = vpop.f32.mrf.mxu0 }
 0x291   : > { %v703_v50 = vadd.f32 %v702_v48, %v619_v47 }
 0x292   : > { %v2594_v49 = vpop.f32.mrf.mxu0 }
 0x293   : > { %v709_v54 = vmax.f32 %v703_v50, 0.0 }
 0x294   : > { %v705_v51 = vpop.f32.mrf.mxu0 }
 0x295   : > { %v706_v52 = vadd.f32 %v705_v51, %v619_v47  ;;  %v2911_v47 = vld [vmem:[#allocation4 + $0x98] sm:$0xff]   ;;  %v2912_v51 = vld [vmem:[#allocation4 + $0x90] sm:$0xff]  }
 0x296   : > { %v2595_v53 = vpop.f32.mrf.mxu0 }
 0x297   : > { %v710_v55 = vmax.f32 %v706_v52, 0.0  ;;  %v2913_v52 = vld [vmem:[#allocation4 + $0x88] sm:$0xff]   ;;  %v2914_v53 = vld [vmem:[#allocation4 + $0x80] sm:$0xff]  }
 0x299   : > { %v711_v56 = vpack.c.bf16 %v710_v55, %v709_v54  ;;  %v2339_v54 = vld [vmem:[%s3422_s4 + $0x4] sm:$0x3] }
 0x29a   : > { %v1118_v55 = vrot.slane %v2339_v54, %v3238_v27 }
 0x29b   : > { %v713_v57 = vunpack.c.h.bf16 %v711_v56  ;;  %v712_v58 = vunpack.c.l.bf16 %v711_v56 }
 0x29d   : > { %2596 = vmatprep.subr.mxu1 %v713_v57 }
 0x29e   : > { %2597 = vmatpush3.msra.mxu1 %v713_v57 }
 0x29f   : > { %2598 = vmatprep.subr.mxu1 %v712_v58 }
 0x2a0   : > { %2599 = vmatpush3.msra.mxu1 %v712_v58 }
 0x2a1   : > { %2601 = vmatmul.mubr.msk.f32.vlgmr.msra.gmra.mxu1 %vm404_vm0, %v3212_v7  ;;  %2623 = vmatprep.subr.bf16.mxu1 %v3071_v0 }
 0x2a2   : > { %2639 = vmatprep.mubr.msk.bf16.mxu1 %vm3072_vm1, %v3071_v0  ;;  %2624 = vmatpush3.bf16.msra.mxu1 %v2891_v60 }
 0x2a3   : > { %2625 = vmatprep.subr.bf16.mxu1 %v3071_v0 }
 0x2a6   : > { %2626 = vmatpush3.bf16.msra.mxu1 %v2892_v61 }
 0x2a7   : > { %2627 = vmatprep.subr.bf16.mxu1 %v3071_v0 }
 0x2aa   : > { %2628 = vmatpush3.bf16.msra.mxu1 %v2893_v62 }
 0x2ab   : > { %2629 = vmatprep.subr.bf16.mxu1 %v3071_v0 }
 0x2ae   : > { %2630 = vmatpush3.bf16.msra.mxu1 %v2894_v63 }
 0x2af   : > { %2631 = vmatprep.subr.bf16.mxu1 %v3071_v0 }
 0x2b2   : > { %2632 = vmatpush3.bf16.msra.mxu1 %v2895_v1 }
 0x2b3   : > { %2633 = vmatprep.subr.bf16.mxu1 %v3071_v0 }
 0x2b6   : > { %2634 = vmatpush3.bf16.msra.mxu1 %v2896_v6  ;;  %v2918_v6 = vld [vmem:[#allocation2 + $0xe0] sm:$0xff]  }
 0x2b7   : > { %2635 = vmatprep.subr.bf16.mxu1 %v3071_v0 }
 0x2ba   : > { %2636 = vmatpush3.bf16.msra.mxu1 %v2897_v8  ;;  %v2919_v8 = vld [vmem:[#allocation2 + $0xd8] sm:$0xff]  }
 0x2bb   : > { %2637 = vmatprep.subr.bf16.mxu1 %v3071_v0 }
 0x2be   : > { %2638 = vmatpush3.bf16.msra.mxu1 %v2898_v9  ;;  %v2920_v9 = vld [vmem:[#allocation2 + $0xd0] sm:$0xff]  }
 0x2bf   : > { %2650 = vmatprep.subr.bf16.mxu1 %v3071_v0 }
 0x361   : > { %v2602_v3 = vpop.f32.mrf.mxu1 }
 0x363   : > { %v780_v4 = vpop.f32.mrf.mxu1 }
 0x364   : > { %v791_v5 = vpack.c.bf16 %v2602_v3, %v780_v4  ;;  %v2915_v3 = vld [vmem:[#allocation2 + $0xf8] sm:$0xff]   ;;  %v2916_v4 = vld [vmem:[#allocation2 + $0xf0] sm:$0xff]  }
 0x366   : > { %2620 = vmatmul.mubr.bf16.vlgmr.msra.gmra.mxu0 %v791_v5  ;;  %v2917_v5 = vld [vmem:[#allocation2 + $0xe8] sm:$0xff]  }
 0x367   : > { %2647 = vmatprep.mubr.msk.f32.mxu0 %vm404_vm0, %v3207_v2 }
 0x426   : > { %v895_v12 = vpop.f32.mrf.mxu0 }
 0x427   : > { %v896_v14 = vadd.f32 %v895_v12, %v812_v11 }
 0x428   : > { %v2621_v13 = vpop.f32.mrf.mxu0 }
 0x429   : > { %v902_v18 = vmax.f32 %v896_v14, 0.0 }
 0x42a   : > { %v898_v15 = vpop.f32.mrf.mxu0 }
 0x42b   : > { %v899_v16 = vadd.f32 %v898_v15, %v812_v11  ;;  %v1231_v11 = vrot.slane %v2339_v54, %v3253_v46 }
 0x42c   : > { %v2622_v17 = vpop.f32.mrf.mxu0 }
 0x42d   : > { %v903_v19 = vmax.f32 %v899_v16, 0.0 }
 0x42f   : > { %v904_v20 = vpack.c.bf16 %v903_v19, %v902_v18 }
 0x431   : > { %2640 = vmatmul.mubr.bf16.vlgmr.msra.gmra.mxu1 %v904_v20 }
 0x432   : > { %2666 = vmatprep.mubr.msk.bf16.mxu1 %vm3072_vm1, %v3071_v0  ;;  %2651 = vmatpush3.bf16.msra.mxu1 %v2899_v21 }
 0x433   : > { %2652 = vmatprep.subr.bf16.mxu1 %v3071_v0 }
 0x436   : > { %2653 = vmatpush3.bf16.msra.mxu1 %v2900_v22 }
 0x437   : > { %2654 = vmatprep.subr.bf16.mxu1 %v3071_v0 }
 0x43a   : > { %2655 = vmatpush3.bf16.msra.mxu1 %v2901_v23  ;;  %v2922_v23 = vld [vmem:[#allocation2 + $0xc0] sm:$0xff]  }
 0x43b   : > { %2656 = vmatprep.subr.bf16.mxu1 %v3071_v0 }
 0x43e   : > { %2657 = vmatpush3.bf16.msra.mxu1 %v2902_v24  ;;  %v2923_v24 = vld [vmem:[#allocation4 + $0xf8] sm:$0xff]  }
 0x43f   : > { %2658 = vmatprep.subr.bf16.mxu1 %v3071_v0 }
 0x442   : > { %2659 = vmatpush3.bf16.msra.mxu1 %v2903_v25  ;;  %v2924_v25 = vld [vmem:[#allocation4 + $0xf0] sm:$0xff]  }
 0x443   : > { %2660 = vmatprep.subr.bf16.mxu1 %v3071_v0 }
 0x446   : > { %2661 = vmatpush3.bf16.msra.mxu1 %v2904_v26  ;;  %v2925_v26 = vld [vmem:[#allocation4 + $0xe8] sm:$0xff]  }
 0x447   : > { %2662 = vmatprep.subr.bf16.mxu1 %v3071_v0 }
 0x44a   : > { %2663 = vmatpush3.bf16.msra.mxu1 %v2905_v28  ;;  %v2926_v28 = vld [vmem:[#allocation4 + $0xe0] sm:$0xff]  }
 0x44b   : > { %2664 = vmatprep.subr.bf16.mxu1 %v3071_v0 }
 0x44e   : > { %2665 = vmatpush3.bf16.msra.mxu1 %v2906_v41 }
 0x4f1   : > { %v1008_v30 = vpop.f32.mrf.mxu1 }
 0x4f2   : > { %v1009_v32 = vadd.f32 %v1008_v30, %v925_v29 }
 0x4f3   : > { %v2641_v31 = vpop.f32.mrf.mxu1 }
 0x4f4   : > { %v1015_v36 = vmax.f32 %v1009_v32, 0.0  ;;  %v2928_v32 = vld [vmem:[#allocation4 + $0xd0] sm:$0xff]  }
 0x4f5   : > { %v1011_v33 = vpop.f32.mrf.mxu1 }
 0x4f6   : > { %v1012_v34 = vadd.f32 %v1011_v33, %v925_v29  ;;  %v2929_v33 = vld [vmem:[#allocation4 + $0xc8] sm:$0xff]  }
 0x4f7   : > { %v2642_v35 = vpop.f32.mrf.mxu1 }
 0x4f8   : > { %v1016_v37 = vmax.f32 %v1012_v34, 0.0  ;;  %v2930_v34 = vld [vmem:[#allocation4 + $0xc0] sm:$0xff]  }
 0x4f9   : > { %v2358_v35 = vld [vmem:[%s3422_s4 + $0x6] sm:$0x3] }
 0x4fa   : > { %v1017_v38 = vpack.c.bf16 %v1016_v37, %v1015_v36  ;;  %v1424_v36 = vrot.slane %v2358_v35, %v3238_v27 }
 0x4fc   : > { %v1019_v39 = vunpack.c.h.bf16 %v1017_v38  ;;  %v1018_v40 = vunpack.c.l.bf16 %v1017_v38 }
 0x4fe   : > { %2643 = vmatprep.subr.mxu0 %v1019_v39 }
 0x4ff   : > { %2644 = vmatpush3.msra.mxu0 %v1019_v39 }
 0x500   : > { %2645 = vmatprep.subr.mxu0 %v1018_v40 }
 0x501   : > { %2646 = vmatpush3.msra.mxu0 %v1018_v40 }
 0x502   : > { %2648 = vmatmul.mubr.msk.f32.vlgmr.msra.gmra.mxu0 %vm404_vm0, %v3212_v7  ;;  %2670 = vmatprep.subr.bf16.mxu0 %v3071_v0 }
 0x503   : > { %2686 = vmatprep.mubr.msk.bf16.mxu0 %vm3072_vm1, %v3071_v0  ;;  %2671 = vmatpush3.bf16.msra.mxu0 %v2907_v42 }
 0x504   : > { %2672 = vmatprep.subr.bf16.mxu0 %v3071_v0 }
 0x507   : > { %2673 = vmatpush3.bf16.msra.mxu0 %v2908_v43 }
 0x508   : > { %2674 = vmatprep.subr.bf16.mxu0 %v3071_v0 }
 0x50b   : > { %2675 = vmatpush3.bf16.msra.mxu0 %v2909_v44 }
 0x50c   : > { %2676 = vmatprep.subr.bf16.mxu0 %v3071_v0 }
 0x50f   : > { %2677 = vmatpush3.bf16.msra.mxu0 %v2910_v45  ;;  %v2931_v45 = vld [vmem:[#allocation2 + $0x138] sm:$0xff]  }
 0x510   : > { %2678 = vmatprep.subr.bf16.mxu0 %v3071_v0 }
 0x513   : > { %2679 = vmatpush3.bf16.msra.mxu0 %v2911_v47  ;;  %v2932_v47 = vld [vmem:[#allocation2 + $0x130] sm:$0xff]  }
 0x514   : > { %2680 = vmatprep.subr.bf16.mxu0 %v3071_v0 }
 0x517   : > { %2681 = vmatpush3.bf16.msra.mxu0 %v2912_v51  ;;  %v2936_v51 = vld [vmem:[#allocation2 + $0x110] sm:$0xff]  }
 0x518   : > { %2682 = vmatprep.subr.bf16.mxu0 %v3071_v0 }
 0x51b   : > { %2683 = vmatpush3.bf16.msra.mxu0 %v2913_v52  ;;  %v2937_v52 = vld [vmem:[#allocation2 + $0x108] sm:$0xff]  }
 0x51c   : > { %2684 = vmatprep.subr.bf16.mxu0 %v3071_v0 }
 0x51f   : > { %2685 = vmatpush3.bf16.msra.mxu0 %v2914_v53  ;;  %v1537_v53 = vrot.slane %v2358_v35, %v3253_v46  ;;  %v2955_v35 = vld [vmem:[#allocation6 + $0x38] sm:$0xff]  }
 0x520   : > { %2697 = vmatprep.subr.bf16.mxu0 %v3071_v0 }
 0x5c2   : > { %v2649_v48 = vpop.f32.mrf.mxu0 }
 0x5c4   : > { %v1086_v49 = vpop.f32.mrf.mxu0 }
 0x5c5   : > { %v1097_v50 = vpack.c.bf16 %v2649_v48, %v1086_v49  ;;  %v2933_v48 = vld [vmem:[#allocation2 + $0x128] sm:$0xff]   ;;  %v2934_v49 = vld [vmem:[#allocation2 + $0x120] sm:$0xff]  }
 0x5c7   : > { %2667 = vmatmul.mubr.bf16.vlgmr.msra.gmra.mxu1 %v1097_v50  ;;  %v2935_v50 = vld [vmem:[#allocation2 + $0x118] sm:$0xff]  }
 0x5c8   : > { %2694 = vmatprep.mubr.msk.f32.mxu1 %vm404_vm0, %v3207_v2 }
 0x687   : > { %v1201_v56 = vpop.f32.mrf.mxu1 }
 0x688   : > { %v1202_v58 = vadd.f32 %v1201_v56, %v1118_v55 }
 0x689   : > { %v2668_v57 = vpop.f32.mrf.mxu1 }
 0x68a   : > { %v1208_v62 = vmax.f32 %v1202_v58, 0.0 }
 0x68b   : > { %v1204_v59 = vpop.f32.mrf.mxu1 }
 0x68c   : > { %v1205_v60 = vadd.f32 %v1204_v59, %v1118_v55 }
 0x68d   : > { %v2669_v61 = vpop.f32.mrf.mxu1 }
 0x68e   : > { %v1209_v63 = vmax.f32 %v1205_v60, 0.0 }
 0x690   : > { %v1210_v1 = vpack.c.bf16 %v1209_v63, %v1208_v62 }
 0x692   : > { %2687 = vmatmul.mubr.bf16.vlgmr.msra.gmra.mxu0 %v1210_v1 }
 0x693   : > { %2713 = vmatprep.mubr.msk.bf16.mxu0 %vm3072_vm1, %v3071_v0  ;;  %2698 = vmatpush3.bf16.msra.mxu0 %v2915_v3  ;;  %v2971_v3 = vld [vmem:[%s3204_s18 + $0x8] sm:$0xff] }
 0x694   : > { %2699 = vmatprep.subr.bf16.mxu0 %v3071_v0 }
 0x697   : > { %2700 = vmatpush3.bf16.msra.mxu0 %v2916_v4  ;;  %v2938_v4 = vld [vmem:[#allocation2 + $0x100] sm:$0xff]  }
 0x698   : > { %2701 = vmatprep.subr.bf16.mxu0 %v3071_v0 }
 0x69b   : > { %2702 = vmatpush3.bf16.msra.mxu0 %v2917_v5  ;;  %v2939_v5 = vld [vmem:[#allocation4 + $0x138] sm:$0xff]  }
 0x69c   : > { %2703 = vmatprep.subr.bf16.mxu0 %v3071_v0 }
 0x69f   : > { %2704 = vmatpush3.bf16.msra.mxu0 %v2918_v6  ;;  %v2940_v6 = vld [vmem:[#allocation4 + $0x130] sm:$0xff]  }
 0x6a0   : > { %2705 = vmatprep.subr.bf16.mxu0 %v3071_v0 }
 0x6a3   : > { %2706 = vmatpush3.bf16.msra.mxu0 %v2919_v8  ;;  %v2941_v8 = vld [vmem:[#allocation4 + $0x128] sm:$0xff]  }
 0x6a4   : > { %2707 = vmatprep.subr.bf16.mxu0 %v3071_v0 }
 0x6a7   : > { %2708 = vmatpush3.bf16.msra.mxu0 %v2920_v9  ;;  %v2942_v9 = vld [vmem:[#allocation4 + $0x120] sm:$0xff]  }
 0x6a8   : > { %2709 = vmatprep.subr.bf16.mxu0 %v3071_v0 }
 0x6ab   : > { %2710 = vmatpush3.bf16.msra.mxu0 %v2921_v10  ;;  %v2943_v10 = vld [vmem:[#allocation4 + $0x118] sm:$0xff]  }
 0x6ac   : > { %2711 = vmatprep.subr.bf16.mxu0 %v3071_v0 }
 0x6af   : > { %2712 = vmatpush3.bf16.msra.mxu0 %v2922_v23 }
 0x752   : > { %v1314_v12 = vpop.f32.mrf.mxu0 }
 0x753   : > { %v1315_v14 = vadd.f32 %v1314_v12, %v1231_v11 }
 0x754   : > { %v2688_v13 = vpop.f32.mrf.mxu0 }
 0x755   : > { %v1321_v18 = vmax.f32 %v1315_v14, 0.0  ;;  %v2944_v14 = vld [vmem:[#allocation4 + $0x110] sm:$0xff]  }
 0x756   : > { %v1317_v15 = vpop.f32.mrf.mxu0 }
 0x757   : > { %v1318_v16 = vadd.f32 %v1317_v15, %v1231_v11  ;;  %v2945_v15 = vld [vmem:[#allocation4 + $0x108] sm:$0xff]  }
 0x758   : > { %v2689_v17 = vpop.f32.mrf.mxu0 }
 0x759   : > { %v1322_v19 = vmax.f32 %v1318_v16, 0.0  ;;  %v2946_v16 = vld [vmem:[#allocation4 + $0x100] sm:$0xff]   ;;  %v2947_v17 = vld [vmem:[%s3423_s5 + $0x38] sm:$0xff]  }
 0x75b   : > { %v1323_v20 = vpack.c.bf16 %v1322_v19, %v1321_v18  ;;  %v2948_v18 = vld [vmem:[%s3423_s5 + $0x30] sm:$0xff]   ;;  %v2949_v19 = vld [vmem:[%s3423_s5 + $0x28] sm:$0xff]  }
 0x75d   : > { %v1325_v21 = vunpack.c.h.bf16 %v1323_v20  ;;  %v1324_v22 = vunpack.c.l.bf16 %v1323_v20  ;;  %v2950_v20 = vld [vmem:[%s3423_s5 + $0x20] sm:$0xff]  }
 0x75f   : > { %2690 = vmatprep.subr.mxu1 %v1325_v21 }
 0x760   : > { %2691 = vmatpush3.msra.mxu1 %v1325_v21  ;;  %v2951_v21 = vld [vmem:[%s3423_s5 + $0x18] sm:$0xff]  }
 0x761   : > { %2692 = vmatprep.subr.mxu1 %v1324_v22 }
 0x762   : > { %2693 = vmatpush3.msra.mxu1 %v1324_v22  ;;  %v2377_v22 = vld [vmem:[%s3422_s4 + $0x8] sm:$0x3] }
 0x763   : > { %2695 = vmatmul.mubr.msk.f32.vlgmr.msra.gmra.mxu1 %vm404_vm0, %v3212_v7  ;;  %2717 = vmatprep.subr.bf16.mxu1 %v3071_v0  ;;  %v2927_v7 = vld [vmem:[#allocation4 + $0xd8] sm:$0xff]   ;;  %v1730_v23 = vrot.slane %v2377_v22, %v3238_v27  ;;  %v2953_v27 = vld [vmem:[%s3423_s5 + $0x8] sm:$0xff]  }
 0x764   : > { %2733 = vmatprep.mubr.msk.bf16.mxu1 %vm3072_vm1, %v3071_v0  ;;  %2718 = vmatpush3.bf16.msra.mxu1 %v2923_v24 }
 0x765   : > { %2719 = vmatprep.subr.bf16.mxu1 %v3071_v0 }
 0x768   : > { %2720 = vmatpush3.bf16.msra.mxu1 %v2924_v25 }
 0x769   : > { %2721 = vmatprep.subr.bf16.mxu1 %v3071_v0 }
 0x76c   : > { %2722 = vmatpush3.bf16.msra.mxu1 %v2925_v26 }
 0x76d   : > { %2723 = vmatprep.subr.bf16.mxu1 %v3071_v0 }
 0x770   : > { %2724 = vmatpush3.bf16.msra.mxu1 %v2926_v28 }
 0x771   : > { %2725 = vmatprep.subr.bf16.mxu1 %v3071_v0 }
 0x774   : > { %2726 = vmatpush3.bf16.msra.mxu1 %v2927_v7 }
 0x775   : > { %2727 = vmatprep.subr.bf16.mxu1 %v3071_v0 }
 0x778   : > { %2728 = vmatpush3.bf16.msra.mxu1 %v2928_v32 }
 0x779   : > { %2729 = vmatprep.subr.bf16.mxu1 %v3071_v0 }
 0x77c   : > { %2730 = vmatpush3.bf16.msra.mxu1 %v2929_v33  ;;  %v2952_v33 = vld [vmem:[%s3423_s5 + $0x10] sm:$0xff]  }
 0x77d   : > { %2731 = vmatprep.subr.bf16.mxu1 %v3071_v0 }
 0x780   : > { %2732 = vmatpush3.bf16.msra.mxu1 %v2930_v34  ;;  %v2954_v34 = vld [vmem:[%s3423_s5] sm:$0xff]  }
 0x781   : > { %2744 = vmatprep.subr.bf16.mxu1 %v3071_v0 }
 0x823   : > { %v2696_v29 = vpop.f32.mrf.mxu1 }
 0x825   : > { %v1392_v30 = vpop.f32.mrf.mxu1 }
 0x826   : > { %v1403_v31 = vpack.c.bf16 %v2696_v29, %v1392_v30 }
 0x828   : > { %2714 = vmatmul.mubr.bf16.vlgmr.msra.gmra.mxu0 %v1403_v31 }
 0x829   : > { %2741 = vmatprep.mubr.msk.f32.mxu0 %vm404_vm0, %v3207_v2 }
 0x8e8   : > { %v1507_v37 = vpop.f32.mrf.mxu0 }
 0x8e9   : > { %v1508_v38 = vadd.f32 %v1507_v37, %v1424_v36  ;;  %v2957_v37 = vld [vmem:[#allocation6 + $0x28] sm:$0xff]  }
 0x8ea   : > { %v2715_v2 = vpop.f32.mrf.mxu0 }
 0x8eb   : > { %v1514_v42 = vmax.f32 %v1508_v38, 0.0  ;;  %v2958_v2 = vld [vmem:[#allocation6 + $0x20] sm:$0xff]   ;;  %v2959_v38 = vld [vmem:[#allocation6 + $0x18] sm:$0xff]  }
 0x8ec   : > { %v1510_v39 = vpop.f32.mrf.mxu0 }
 0x8ed   : > { %v1511_v40 = vadd.f32 %v1510_v39, %v1424_v36  ;;  %v2956_v36 = vld [vmem:[#allocation6 + $0x30] sm:$0xff]   ;;  %v1843_v39 = vrot.slane %v2377_v22, %v3253_v46  ;;  %v2394_v46 = vld [vmem:[%s3424_s6] ss:$0 sm:$0xff] }
 0x8ee   : > { %v2716_v41 = vpop.f32.mrf.mxu0 }
 0x8ef   : > { %v1515_v43 = vmax.f32 %v1511_v40, 0.0 }
 0x8f1   : > { %v1516_v44 = vpack.c.bf16 %v1515_v43, %v1514_v42 }
 0x8f3   : > { %2734 = vmatmul.mubr.bf16.vlgmr.msra.gmra.mxu1 %v1516_v44 }
 0x8f4   : > { %2760 = vmatprep.mubr.msk.bf16.mxu1 %vm3072_vm1, %v3071_v0  ;;  %2745 = vmatpush3.bf16.msra.mxu1 %v2931_v45 }
 0x8f5   : > { %2746 = vmatprep.subr.bf16.mxu1 %v3071_v0 }
 0x8f8   : > { %2747 = vmatpush3.bf16.msra.mxu1 %v2932_v47 }
 0x8f9   : > { %2748 = vmatprep.subr.bf16.mxu1 %v3071_v0 }
 0x8fc   : > { %2749 = vmatpush3.bf16.msra.mxu1 %v2933_v48 }
 0x8fd   : > { %2750 = vmatprep.subr.bf16.mxu1 %v3071_v0 }
 0x900   : > { %2751 = vmatpush3.bf16.msra.mxu1 %v2934_v49 }
 0x901   : > { %2752 = vmatprep.subr.bf16.mxu1 %v3071_v0 }
 0x904   : > { %2753 = vmatpush3.bf16.msra.mxu1 %v2935_v50  ;;  %v2960_v50 = vld [vmem:[#allocation6 + $0x10] sm:$0xff]  }
 0x905   : > { %2754 = vmatprep.subr.bf16.mxu1 %v3071_v0 }
 0x908   : > { %2755 = vmatpush3.bf16.msra.mxu1 %v2936_v51  ;;  %v2961_v51 = vld [vmem:[#allocation6 + $0x8] sm:$0xff]  }
 0x909   : > { %2756 = vmatprep.subr.bf16.mxu1 %v3071_v0 }
 0x90c   : > { %2757 = vmatpush3.bf16.msra.mxu1 %v2937_v52  ;;  %v2962_v52 = vld [vmem:[#allocation6] sm:$0xff]  }
 0x90d   : > { %2758 = vmatprep.subr.bf16.mxu1 %v3071_v0 }
 0x910   : > { %2759 = vmatpush3.bf16.msra.mxu1 %v2938_v4 }
 0x911   : > { %2784 = vmatprep.subr.bf16.mxu1 %v3071_v0 }
 0x9b3   : > { %v1620_v54 = vpop.f32.mrf.mxu1 }
 0x9b4   : > { %v1621_v56 = vadd.f32 %v1620_v54, %v1537_v53 }
 0x9b5   : > { %v2735_v55 = vpop.f32.mrf.mxu1 }
 0x9b6   : > { %v1627_v60 = vmax.f32 %v1621_v56, 0.0 }
 0x9b7   : > { %v1623_v57 = vpop.f32.mrf.mxu1 }
 0x9b8   : > { %v1624_v58 = vadd.f32 %v1623_v57, %v1537_v53 }
 0x9b9   : > { %v2736_v59 = vpop.f32.mrf.mxu1 }
 0x9ba   : > { %v1628_v61 = vmax.f32 %v1624_v58, 0.0 }
 0x9bc   : > { %v1629_v62 = vpack.c.bf16 %v1628_v61, %v1627_v60 }
 0x9be   : > { %v1631_v63 = vunpack.c.h.bf16 %v1629_v62  ;;  %v1630_v1 = vunpack.c.l.bf16 %v1629_v62 }
 0x9c0   : > { %2737 = vmatprep.subr.mxu0 %v1631_v63 }
 0x9c1   : > { %2738 = vmatpush3.msra.mxu0 %v1631_v63 }
 0x9c2   : > { %2739 = vmatprep.subr.mxu0 %v1630_v1 }
 0x9c3   : > { %2740 = vmatpush3.msra.mxu0 %v1630_v1 }
 0x9c4   : > { %2742 = vmatmul.mubr.msk.f32.vlgmr.msra.gmra.mxu0 %vm404_vm0, %v2971_v3  ;;  %2764 = vmatprep.subr.bf16.mxu0 %v3071_v0 }
 0x9c5   : > { %2780 = vmatprep.mubr.msk.bf16.mxu0 %vm3072_vm1, %v3071_v0  ;;  %2765 = vmatpush3.bf16.msra.mxu0 %v2939_v5 }
 0x9c6   : > { %2766 = vmatprep.subr.bf16.mxu0 %v3071_v0 }
 0x9c9   : > { %2767 = vmatpush3.bf16.msra.mxu0 %v2940_v6 }
 0x9ca   : > { %2768 = vmatprep.subr.bf16.mxu0 %v3071_v0 }
 0x9cd   : > { %2769 = vmatpush3.bf16.msra.mxu0 %v2941_v8 }
 0x9ce   : > { %2770 = vmatprep.subr.bf16.mxu0 %v3071_v0 }
 0x9d1   : > { %2771 = vmatpush3.bf16.msra.mxu0 %v2942_v9 }
 0x9d2   : > { %2772 = vmatprep.subr.bf16.mxu0 %v3071_v0 }
 0x9d5   : > { %2773 = vmatpush3.bf16.msra.mxu0 %v2943_v10 }
 0x9d6   : > { %2774 = vmatprep.subr.bf16.mxu0 %v3071_v0 }
 0x9d9   : > { %2775 = vmatpush3.bf16.msra.mxu0 %v2944_v14 }
 0x9da   : > { %2776 = vmatprep.subr.bf16.mxu0 %v3071_v0 }
 0x9dd   : > { %2777 = vmatpush3.bf16.msra.mxu0 %v2945_v15 }
 0x9de   : > { %2778 = vmatprep.subr.bf16.mxu0 %v3071_v0 }
 0x9e1   : > { %2779 = vmatpush3.bf16.msra.mxu0 %v2946_v16 }
 0x9e2   : > { %2804 = vmatprep.subr.bf16.mxu0 %v3071_v0 }
 0xa84   : > { %v2743_v11 = vpop.f32.mrf.mxu0 }
 0xa86   : > { %v1698_v12 = vpop.f32.mrf.mxu0 }
 0xa87   : > { %v1709_v13 = vpack.c.bf16 %v2743_v11, %v1698_v12 }
 0xa89   : > { %2761 = vmatmul.mubr.bf16.vlgmr.msra.gmra.mxu1 %v1709_v13 }
 0xa8a   : > { %2800 = vmatprep.mubr.msk.bf16.mxu1 %vm3072_vm1, %v3071_v0  ;;  %2785 = vmatpush3.bf16.msra.mxu1 %v2947_v17 }
 0xa8b   : > { %2786 = vmatprep.subr.bf16.mxu1 %v3071_v0 }
 0xa8e   : > { %2787 = vmatpush3.bf16.msra.mxu1 %v2948_v18 }
 0xa8f   : > { %2788 = vmatprep.subr.bf16.mxu1 %v3071_v0 }
 0xa92   : > { %2789 = vmatpush3.bf16.msra.mxu1 %v2949_v19 }
 0xa93   : > { %2790 = vmatprep.subr.bf16.mxu1 %v3071_v0 }
 0xa96   : > { %2791 = vmatpush3.bf16.msra.mxu1 %v2950_v20 }
 0xa97   : > { %2792 = vmatprep.subr.bf16.mxu1 %v3071_v0 }
 0xa9a   : > { %2793 = vmatpush3.bf16.msra.mxu1 %v2951_v21 }
 0xa9b   : > { %2794 = vmatprep.subr.bf16.mxu1 %v3071_v0 }
 0xa9e   : > { %2795 = vmatpush3.bf16.msra.mxu1 %v2952_v33 }
 0xa9f   : > { %2796 = vmatprep.subr.bf16.mxu1 %v3071_v0 }
 0xaa2   : > { %2797 = vmatpush3.bf16.msra.mxu1 %v2953_v27 }
 0xaa3   : > { %2798 = vmatprep.subr.bf16.mxu1 %v3071_v0 }
 0xaa6   : > { %2799 = vmatpush3.bf16.msra.mxu1 %v2954_v34 }
 0xb49   : > { %v1813_v24 = vpop.f32.mrf.mxu1 }
 0xb4a   : > { %v1814_v26 = vadd.f32 %v1813_v24, %v1730_v23 }
 0xb4b   : > { %v2762_v25 = vpop.f32.mrf.mxu1 }
 0xb4c   : > { %v1820_v30 = vmax.f32 %v1814_v26, 0.0 }
 0xb4d   : > { %v1816_v28 = vpop.f32.mrf.mxu1 }
 0xb4e   : > { %v1817_v7 = vadd.f32 %v1816_v28, %v1730_v23 }
 0xb4f   : > { %v2763_v29 = vpop.f32.mrf.mxu1 }
 0xb50   : > { %v1821_v31 = vmax.f32 %v1817_v7, 0.0 }
 0xb52   : > { %v1822_v32 = vpack.c.bf16 %v1821_v31, %v1820_v30 }
 0xb54   : > { %2781 = vmatmul.mubr.bf16.vlgmr.msra.gmra.mxu0 %v1822_v32 }
 0xb55   : > { %2820 = vmatprep.mubr.msk.bf16.mxu0 %vm3072_vm1, %v3071_v0  ;;  %2805 = vmatpush3.bf16.msra.mxu0 %v2955_v35 }
 0xb56   : > { %2806 = vmatprep.subr.bf16.mxu0 %v3071_v0 }
 0xb59   : > { %2807 = vmatpush3.bf16.msra.mxu0 %v2956_v36 }
 0xb5a   : > { %2808 = vmatprep.subr.bf16.mxu0 %v3071_v0 }
 0xb5d   : > { %2809 = vmatpush3.bf16.msra.mxu0 %v2957_v37 }
 0xb5e   : > { %2810 = vmatprep.subr.bf16.mxu0 %v3071_v0 }
 0xb61   : > { %2811 = vmatpush3.bf16.msra.mxu0 %v2958_v2 }
 0xb62   : > { %2812 = vmatprep.subr.bf16.mxu0 %v3071_v0 }
 0xb65   : > { %2813 = vmatpush3.bf16.msra.mxu0 %v2959_v38 }
 0xb66   : > { %2814 = vmatprep.subr.bf16.mxu0 %v3071_v0 }
 0xb69   : > { %2815 = vmatpush3.bf16.msra.mxu0 %v2960_v50 }
 0xb6a   : > { %2816 = vmatprep.subr.bf16.mxu0 %v3071_v0 }
 0xb6d   : > { %2817 = vmatpush3.bf16.msra.mxu0 %v2961_v51 }
 0xb6e   : > { %2818 = vmatprep.subr.bf16.mxu0 %v3071_v0  ;;  %v2403_v0 = vld [vmem:[%s3426_s8] ss:$0 sm:$0xff] }
 0xb71   : > { %2819 = vmatpush3.bf16.msra.mxu0 %v2962_v52 }
 0xc14   : > { %v1926_v40 = vpop.f32.mrf.mxu0 }
 0xc15   : > { %v1927_v42 = vadd.f32 %v1926_v40, %v1843_v39 }
 0xc16   : > { %v2782_v41 = vpop.f32.mrf.mxu0 }
 0xc17   : > { %v1933_v47 = vmax.f32 %v1927_v42, 0.0 }
 0xc18   : > { %v1929_v43 = vpop.f32.mrf.mxu0 }
 0xc19   : > { %v1930_v44 = vadd.f32 %v1929_v43, %v1843_v39 }
 0xc1a   : > { %v2783_v45 = vpop.f32.mrf.mxu0 }
 0xc1b   : > { %v1934_v48 = vmax.f32 %v1930_v44, 0.0 }
 0xc1d   : > { %v1935_v49 = vpack.c.bf16 %v1934_v48, %v1933_v47 }
 0xc1f   : > { %2801 = vmatmul.mubr.bf16.vlgmr.msra.gmra.mxu1 %v1935_v49 }
 0xcdf   : > { %v2041_v53 = vpop.f32.mrf.mxu1 }
 0xce0   : > { %v2042_v55 = vadd.f32 %v2394_v46, %v2041_v53 }
 0xce1   : > { %v2802_v54 = vpop.f32.mrf.mxu1 }
 0xce2   : > { %v2048_v59 = vmax.f32 %v2042_v55, 0.0 }
 0xce3   : > { %v2044_v56 = vpop.f32.mrf.mxu1 }
 0xce4   : > { %v2045_v57 = vadd.f32 %v2394_v46, %v2044_v56 }
 0xce5   : > { %v2803_v58 = vpop.f32.mrf.mxu1 }
 0xce6   : > { %v2049_v60 = vmax.f32 %v2045_v57, 0.0 }
 0xce8   : > { %v2050_v61 = vpack.c.bf16 %v2049_v60, %v2048_v59 }
 0xcea   : > { %2821 = vmatmul.mubr.bf16.vlgmr.msra.gmra.mxu0 %v2050_v61 }
 0xdaa   : > { %v2156_v62 = vpop.f32.mrf.mxu0 }
 0xdab   : > { %v2157_v63 = vadd.f32 %v2403_v0, %v2156_v62 }
 0xdac   : > { %v2822_v1 = vpop.f32.mrf.mxu0 }
 0xdad   : > { %2163 = vmax.xlane.f32.xlu0 %v2157_v63 }
 0xdae   : > { %v2159_v3 = vpop.f32.mrf.mxu0 }
 0xdaf   : > { %v2160_v4 = vadd.f32 %v2403_v0, %v2159_v3 }
 0xdb0   : > { %v2823_v5 = vpop.f32.mrf.mxu0 }
 0xdb1   : > { %2165 = vmax.xlane.f32.xlu0 %v2160_v4 }
 0xe36   : > { %v2164_v6 = vpop.xlane.xlu0 %2163 }
 0xe37   : > { %v2167_v8 = vsub.f32 %v2157_v63, %v2164_v6 }
 0xe39   : > { %v2169_v9 = vmul.f32 1.442695, %v2167_v8 }
 0xe3a   : > { %v2166_v10 = vpop.xlane.xlu0 %2165 }
 0xe3b   : > { %v2168_v11 = vsub.f32 %v2160_v4, %v2166_v10  ;;  %2963 = vpow2.f32 %v2169_v9 }
 0xe3d   : > { %v2171_v12 = vmul.f32 1.442695, %v2168_v11 }
 0xe3f   : > { %2965 = vpow2.f32 %v2171_v12 }
 0xe48   : > { %v2964_v13 = vpop.eup %2963 }
 0xe49   : > { %2173 = vadd.xlane.f32.xlu1 %v2964_v13 }
 0xe4c   : > { %v2966_v14 = vpop.eup %2965 }
 0xe4d   : > { %2175 = vadd.xlane.f32.xlu1 %v2966_v14 }
 0xed2   : > { %v2174_v15 = vpop.xlane.xlu1 %2173 }
 0xed3   : > { %2967 = vlog2.f32 %v2174_v15 }
 0xed6   : > { %v2176_v16 = vpop.xlane.xlu1 %2175 }
 0xed7   : > { %2969 = vlog2.f32 %v2176_v16 }
 0xee0   : > { %v2968_v17 = vpop.eup %2967 }
 0xee1   : > { %v2178_v18 = vmul.f32 0.6931472, %v2968_v17 }
 0xee3   : > { %v2181_v19 = vsub.f32 %v2167_v8, %v2178_v18 }
 0xee4   : > { %v2970_v20 = vpop.eup %2969 }
 0xee5   : > { %2183 = vst [vmem:[%s396_s15] sm:$0xff] %v2181_v19  ;;  %v2180_v21 = vmul.f32 0.6931472, %v2970_v20 }
 0xee7   : > { %v2182_v22 = vsub.f32 %v2168_v11, %v2180_v21 }
 0xee9   : > { %2184 = vst [vmem:[%s396_s15 + $0x8] sm:$0xff] %v2182_v22 }
 0xeea PF: > { %s21_s30 = sadd.s32 1, %s3064_s30  }
 0xeeb   : > { %p18_p2 = scmp.ge.s32.totalorder %s21_s30, 6  }
 0xeed   :  { %20 = sbr.rel (!%p18_p2) target bundleno = 2 (0x2), region = 114 }
 0xef2   :  { %2206 = vsyncpa [#allocation3], 1 }
 0xef3   :  { %2208 = vsyncpa [#allocation3 + $0x1], 1 }
 0xef4   :  { %2209 = vsyncpa [#allocation5], 1 }

</bundles_post_ra>
